<compile_context>
chip_gen: v7x
topology: tpu7x:2x2x1
jax: 0.10.0
libtpu: 0.0.40
codegen_flags: <defaults>
</compile_context>

<pallas_src>
import jax
import jax.numpy as jnp
from jax import lax
from jax.experimental import pallas as pl
from jax.experimental.pallas import tpu as pltpu

LANE = 128
K_FC1 = 512                       # 25 * 16 real fc1 features, padded to a lane multiple
_VMEM_LIMIT = 32 * 1024 * 1024    # safe on v5e/v6e (128 MiB) and v7x (64 MiB)


def _round_up(x, m):
    return (x + m - 1) // m * m


def _pick_tile(m, max_tile, min_steps=2):
    """Row-tile size (multiple of 16 for bf16 sublane packing) and padded M.

    Aims for >= min_steps grid steps so the "parallel" grid axis can shard
    across v7x's two TensorCores and the input DMA pipeline has overlap."""
    tile = max(16, min(max_tile, _round_up(-(-m // min_steps), 16)))
    mp = max(_round_up(m, tile), min_steps * tile)
    return tile, mp


# ----------------------------- Pallas kernels ------------------------------

def _conv_relu_pool_kernel(cols_ref, w_ref, b_ref, o_ref):
    """Fused conv-as-matmul + 2x2 max-pool + bias + ReLU.

    cols_ref: (4, Mt, Kp) bf16 -- im2col rows for the 4 pool quadrants
    w_ref:    (Kp, 128)   bf16 -- (kh, kw, cin)-ordered conv weight, zero-padded
    b_ref:    (1, 128)    f32
    o_ref:    (Mt, 128)   bf16 -- pooled activations, channels lane-dense
    """
    mt = o_ref.shape[0]
    kp = cols_ref.shape[-1]
    # One long-M matmul instead of 4 short ones (keeps RHS resident in the MXU).
    z = jnp.dot(cols_ref[...].reshape(4 * mt, kp), w_ref[...],
                preferred_element_type=jnp.float32)
    z = z.reshape(4, mt, LANE)
    pooled = jnp.maximum(jnp.maximum(z[0], z[1]), jnp.maximum(z[2], z[3]))
    # bias + ReLU once on the pooled tile: relu(max_i(z_i) + b) == max_i relu(z_i + b)
    o_ref[...] = jnp.maximum(pooled + b_ref[...], 0.0).astype(o_ref.dtype)


def _fc3_kernel(x_ref, w1_ref, b1_ref, w2_ref, b2_ref, w3_ref, b3_ref, o_ref):
    """fc1 + ReLU + fc2 + ReLU + fc3 fused; intermediates stay in VMEM/vregs."""
    h = jnp.dot(x_ref[...], w1_ref[...], preferred_element_type=jnp.float32)
    h = jnp.maximum(h + b1_ref[...], 0.0)
    h = jnp.dot(h.astype(w2_ref.dtype), w2_ref[...],
                preferred_element_type=jnp.float32)
    h = jnp.maximum(h + b2_ref[...], 0.0)
    h = jnp.dot(h.astype(w3_ref.dtype), w3_ref[...],
                preferred_element_type=jnp.float32)
    o_ref[...] = (h + b3_ref[...]).astype(o_ref.dtype)


# ----------------------------- pallas_call wrappers -------------------------

def _conv_relu_pool_call(cols, w, b, m_tile):
    _, mp, kp = cols.shape
    return pl.pallas_call(
        _conv_relu_pool_kernel,
        out_shape=jax.ShapeDtypeStruct((mp, LANE), jnp.bfloat16),
        grid_spec=pltpu.PrefetchScalarGridSpec(
            num_scalar_prefetch=0,
            grid=(mp // m_tile,),
            in_specs=[
                pl.BlockSpec((4, m_tile, kp), lambda i: (0, i, 0)),
                pl.BlockSpec((kp, LANE), lambda i: (0, 0)),
                pl.BlockSpec((1, LANE), lambda i: (0, 0)),
            ],
            out_specs=pl.BlockSpec((m_tile, LANE), lambda i: (i, 0)),
        ),
        compiler_params=pltpu.CompilerParams(
            dimension_semantics=("parallel",),
            vmem_limit_bytes=_VMEM_LIMIT),
    )(cols, w, b)


def _fc3_call(x, w1, b1, w2, b2, w3, b3, m_tile):
    mp, k = x.shape
    full = lambda a: pl.BlockSpec(a.shape, lambda i: (0, 0))
    return pl.pallas_call(
        _fc3_kernel,
        out_shape=jax.ShapeDtypeStruct((mp, LANE), jnp.float32),
        grid_spec=pltpu.PrefetchScalarGridSpec(
            num_scalar_prefetch=0,
            grid=(mp // m_tile,),
            in_specs=[pl.BlockSpec((m_tile, k), lambda i: (i, 0)),
                      full(w1), full(b1), full(w2), full(b2), full(w3), full(b3)],
            out_specs=pl.BlockSpec((m_tile, LANE), lambda i: (i, 0)),
        ),
        compiler_params=pltpu.CompilerParams(
            dimension_semantics=("parallel",),
            vmem_limit_bytes=_VMEM_LIMIT),
    )(x, w1, b1, w2, b2, w3, b3)


# ------------------------------ host-side glue ------------------------------

def _im2col_pool_quadrants(x_nhwc, k, k_pad):
    """(N, H, W, C) bf16 -> (4, N*h2*w2, k_pad) bf16 quadrant-ordered patches.

    Quadrant 2*dh+dw holds the (kh, kw, c)-ordered patches of the conv-output
    pixels (2*h2i+dh, 2*w2i+dw); the kernel max-reduces over the 4 quadrants.
    Built in a single slice+concat pass directly from x (the zero K-padding is
    folded into the same concatenate), so there is no extra stacked/restrided
    f32 intermediate in HBM."""
    n, h, w, c = x_nhwc.shape
    h2, w2 = (h - k + 1) // 2, (w - k + 1) // 2
    kk = k * k * c
    quads = []
    for dh in range(2):
        for dw in range(2):
            pieces = [x_nhwc[:, dh + kh::2, dw + kw::2, :][:, :h2, :w2, :]
                      for kh in range(k) for kw in range(k)]
            if k_pad > kk:
                pieces.append(jnp.zeros((n, h2, w2, k_pad - kk), x_nhwc.dtype))
            quads.append(jnp.concatenate(pieces, axis=-1)
                         .reshape(n * h2 * w2, k_pad))
    return jnp.stack(quads, axis=0)


def conv_relu_pool(x_nhwc, w_packed, b_packed, k=5, max_m_tile=1024):
    """Valid stride-1 conv + ReLU + 2x2 max-pool in one fused Pallas kernel.
    Returns (N, Ho//2, Wo//2, 128) bf16; channels >= Cout are exactly zero."""
    n, h, w, _ = x_nhwc.shape
    h2, w2 = (h - k + 1) // 2, (w - k + 1) // 2
    kp = w_packed.shape[0]
    m = n * h2 * w2
    m_tile, mp = _pick_tile(m, max_m_tile)
    cols = _im2col_pool_quadrants(x_nhwc, k, kp)              # (4, M, Kp) bf16
    if mp > m:
        cols = jnp.pad(cols, ((0, 0), (0, mp - m), (0, 0)))
    out = _conv_relu_pool_call(cols, w_packed, b_packed, m_tile)
    return out[:m].reshape(n, h2, w2, LANE)


def lenet_forward(packed, x):
    """x: (N, 3, 32, 32) NCHW f32 -> logits (N, 10) f32."""
    n = x.shape[0]
    x_nhwc = jnp.transpose(x, (0, 2, 3, 1)).astype(jnp.bfloat16)
    p1 = conv_relu_pool(x_nhwc, packed["conv1_w"], packed["conv1_b"])       # (N,14,14,128)
    p2 = conv_relu_pool(p1[..., :6], packed["conv2_w"], packed["conv2_b"])  # (N,5,5,128)
    # fc1's packed weight absorbs the NCHW flatten permutation; only the 16
    # real channels are kept, so fc1's contraction dim is 512 instead of 3200.
    feats = p2[..., :16].reshape(n, 25 * 16)
    m_tile, mp = _pick_tile(n, 512)
    feats = jnp.pad(feats, ((0, mp - n), (0, K_FC1 - 25 * 16)))
    logits = _fc3_call(feats, packed["fc1_w"], packed["fc1_b"],
                       packed["fc2_w"], packed["fc2_b"],
                       packed["fc3_w"], packed["fc3_b"], m_tile)
    return logits[:n, :10]


# ------------------------------- parameters ---------------------------------

def init_params(key):
    """PyTorch-style uniform(-1/sqrt(fan_in), 1/sqrt(fan_in)) init (f32)."""
    ks = jax.random.split(key, 10)

    def u(k, shape, fan_in):
        bound = 1.0 / float(fan_in) ** 0.5
        return jax.random.uniform(k, shape, jnp.float32, -bound, bound)

    return {
        "conv1_w": u(ks[0], (6, 3, 5, 5), 3 * 5 * 5),
        "conv1_b": u(ks[1], (6,), 3 * 5 * 5),
        "conv2_w": u(ks[2], (16, 6, 5, 5), 6 * 5 * 5),
        "conv2_b": u(ks[3], (16,), 6 * 5 * 5),
        "fc1_w": u(ks[4], (120, 16 * 5 * 5), 16 * 5 * 5),
        "fc1_b": u(ks[5], (120,), 16 * 5 * 5),
        "fc2_w": u(ks[6], (84, 120), 120),
        "fc2_b": u(ks[7], (84,), 120),
        "fc3_w": u(ks[8], (10, 84), 84),
        "fc3_b": u(ks[9], (10,), 84),
    }


def prepare_params(p):
    """One-time packing into kernel layouts: transposed, zero-padded to lane
    multiples of 128, matmul operands stored in bf16, biases in f32."""
    def pad2(a, rows, cols, dtype):
        out = jnp.zeros((rows, cols), dtype)
        return out.at[:a.shape[0], :a.shape[1]].set(a.astype(dtype))

    def conv_w(w):                                # (Cout, Cin, kh, kw) -> (Kp, 128)
        co, ci, kh, kw = w.shape
        k2 = jnp.transpose(w, (2, 3, 1, 0)).reshape(kh * kw * ci, co)  # (kh,kw,ci) order
        return pad2(k2, _round_up(kh * kw * ci, LANE), LANE, jnp.bfloat16)

    def bias(b):
        return pad2(b.reshape(1, -1), 1, LANE, jnp.float32)

    # fc1: fold PyTorch's NCHW flatten (index c*25 + s) into the kernel's
    # pooled layout (index s*16 + c); K is padded 400 -> 512, Cout 120 -> 128.
    w1 = jnp.transpose(p["fc1_w"].reshape(120, 16, 25), (2, 1, 0)).reshape(400, 120)
    w1p = pad2(w1, K_FC1, LANE, jnp.bfloat16)

    return {
        "conv1_w": conv_w(p["conv1_w"]), "conv1_b": bias(p["conv1_b"]),
        "conv2_w": conv_w(p["conv2_w"]), "conv2_b": bias(p["conv2_b"]),
        "fc1_w": w1p, "fc1_b": bias(p["fc1_b"]),
        "fc2_w": pad2(p["fc2_w"].T, LANE, LANE, jnp.bfloat16),
        "fc2_b": bias(p["fc2_b"]),
        "fc3_w": pad2(p["fc3_w"].T, LANE, LANE, jnp.bfloat16),
        "fc3_b": bias(p["fc3_b"]),
    }


# ------------------------------- reference ----------------------------------

def lenet_reference(params, x):
    """Pure-XLA reference matching the PyTorch module (validation only)."""
    def conv(z, w, b):
        y = lax.conv_general_dilated(z, w, (1, 1), "VALID",
                                     dimension_numbers=("NCHW", "OIHW", "NCHW"))
        return jax.nn.relu(y + b[None, :, None, None])

    def pool(z):
        n, c, h, w = z.shape
        return z.reshape(n, c, h // 2, 2, w // 2, 2).max(axis=(3, 5))

    out = pool(conv(x, params["conv1_w"], params["conv1_b"]))
    out = pool(conv(out, params["conv2_w"], params["conv2_b"]))
    out = out.reshape(out.shape[0], -1)
    out = jax.nn.relu(out @ params["fc1_w"].T + params["fc1_b"])
    out = jax.nn.relu(out @ params["fc2_w"].T + params["fc2_b"])
    return out @ params["fc3_w"].T + params["fc3_b"]


if __name__ == "__main__":
    key = jax.random.PRNGKey(0)
    pkey, xkey = jax.random.split(key)
    params = init_params(pkey)
    packed = prepare_params(params)          # one-time weight packing
    # LeNet requires 32x32 spatial input (16*5*5 flatten before fc1); batch=2.
    x = jax.random.normal(xkey, (2, 3, 32, 32), dtype=jnp.float32)

    logits = jax.block_until_ready(jax.jit(lenet_forward)(packed, x))
    assert logits.shape == (2, 10) and logits.dtype == jnp.float32

    ref = jax.block_until_ready(jax.jit(lenet_reference)(params, x))
    err = float(jnp.max(jnp.abs(logits - ref)))
    assert err < 5e-2, f"kernel/reference mismatch: max abs err {err}"
    print("KERNEL_OK")
</pallas_src>

<mosaic_0001>
module attributes {stable_mosaic.version = 11 : i64} {
  func.func @_conv_relu_pool_kernel(%arg0: i32, %arg1: memref<4x208x128xbf16, #tpu.memory_space<vmem>>, %arg2: memref<128x128xbf16, #tpu.memory_space<vmem>>, %arg3: memref<1x128xf32, #tpu.memory_space<vmem>>, %arg4: memref<208x128xbf16, #tpu.memory_space<vmem>>) attributes {dimension_semantics = [#tpu.dimension_semantics<parallel>], iteration_bounds = array<i64: 2>, scalar_prefetch = 0 : i64, scratch_operands = 0 : i64, tpu.core_type = #tpu.core_type<tc>, window_params = [{transform_indices = @transform_0, window_bounds = array<i64: 4, 208, 128>}, {pipeline_mode = #tpu.pipeline_mode<synchronous>, transform_indices = @transform_1, window_bounds = array<i64: 128, 128>}, {pipeline_mode = #tpu.pipeline_mode<synchronous>, transform_indices = @transform_2, window_bounds = array<i64: 1, 128>}, {transform_indices = @transform_3, window_bounds = array<i64: 208, 128>}]} {
    %c0 = arith.constant 0 : index
    %c0_0 = arith.constant 0 : index
    %c0_1 = arith.constant 0 : index
    %0 = vector.load %arg1[%c0, %c0_0, %c0_1] : memref<4x208x128xbf16, #tpu.memory_space<vmem>>, vector<4x208x128xbf16>
    %1 = vector.shape_cast %0 : vector<4x208x128xbf16> to vector<832x128xbf16>
    %c0_2 = arith.constant 0 : index
    %c0_3 = arith.constant 0 : index
    %2 = vector.load %arg2[%c0_2, %c0_3] : memref<128x128xbf16, #tpu.memory_space<vmem>>, vector<128x128xbf16>
    %cst = arith.constant dense<0.000000e+00> : vector<832x128xf32>
    %3 = tpu.matmul %1, %2, %cst {dimension_numbers = #tpu.dot_dimension_numbers<[1], [0], [0], [1], [0, 0, 1, 1], [], []>} : vector<832x128xbf16>, vector<128x128xbf16>, vector<832x128xf32> -> vector<832x128xf32>
    %4 = vector.shape_cast %3 : vector<832x128xf32> to vector<4x208x128xf32>
    %5 = vector.extract_strided_slice %4 {offsets = [0, 0, 0], sizes = [1, 208, 128], strides = [1, 1, 1]} : vector<4x208x128xf32> to vector<1x208x128xf32>
    %6 = vector.shape_cast %5 : vector<1x208x128xf32> to vector<208x128xf32>
    %7 = vector.extract_strided_slice %4 {offsets = [1, 0, 0], sizes = [1, 208, 128], strides = [1, 1, 1]} : vector<4x208x128xf32> to vector<1x208x128xf32>
    %8 = vector.shape_cast %7 : vector<1x208x128xf32> to vector<208x128xf32>
    %9 = arith.maximumf %6, %8 : vector<208x128xf32>
    %10 = vector.extract_strided_slice %4 {offsets = [2, 0, 0], sizes = [1, 208, 128], strides = [1, 1, 1]} : vector<4x208x128xf32> to vector<1x208x128xf32>
    %11 = vector.shape_cast %10 : vector<1x208x128xf32> to vector<208x128xf32>
    %12 = vector.extract_strided_slice %4 {offsets = [3, 0, 0], sizes = [1, 208, 128], strides = [1, 1, 1]} : vector<4x208x128xf32> to vector<1x208x128xf32>
    %13 = vector.shape_cast %12 : vector<1x208x128xf32> to vector<208x128xf32>
    %14 = arith.maximumf %11, %13 : vector<208x128xf32>
    %15 = arith.maximumf %9, %14 : vector<208x128xf32>
    %c0_4 = arith.constant 0 : index
    %c0_5 = arith.constant 0 : index
    %16 = vector.load %arg3[%c0_4, %c0_5] : memref<1x128xf32, #tpu.memory_space<vmem>>, vector<1x128xf32>
    %17 = vector.broadcast %16 : vector<1x128xf32> to vector<208x128xf32>
    %18 = arith.addf %15, %17 : vector<208x128xf32>
    %cst_6 = arith.constant 0.000000e+00 : f32
    %19 = vector.broadcast %cst_6 : f32 to vector<208x128xf32>
    %20 = arith.maximumf %18, %19 : vector<208x128xf32>
    %21 = arith.truncf %20 : vector<208x128xf32> to vector<208x128xbf16>
    %c0_7 = arith.constant 0 : index
    %c0_8 = arith.constant 0 : index
    %22 = vector.load %arg4[%c0_7, %c0_8] : memref<208x128xbf16, #tpu.memory_space<vmem>>, vector<208x128xbf16>
    tpu.vector_store %arg4[%c0_7, %c0_8], %21 {strides = array<i32>} : memref<208x128xbf16, #tpu.memory_space<vmem>>, vector<208x128xbf16>,
    return
  }
  func.func @transform_0(%arg0: i32) -> (i32, i32, i32) {
    %c0_i32 = arith.constant 0 : i32
    %c0_i32_0 = arith.constant 0 : i32
    %c0_i32_1 = arith.constant 0 : i32
    return %c0_i32, %arg0, %c0_i32_0 : i32, i32, i32
  }
  func.func @transform_1(%arg0: i32) -> (i32, i32) {
    %c0_i32 = arith.constant 0 : i32
    %c0_i32_0 = arith.constant 0 : i32
    %c0_i32_1 = arith.constant 0 : i32
    return %c0_i32, %c0_i32_0 : i32, i32
  }
  func.func @transform_2(%arg0: i32) -> (i32, i32) {
    %c0_i32 = arith.constant 0 : i32
    %c0_i32_0 = arith.constant 0 : i32
    %c0_i32_1 = arith.constant 0 : i32
    return %c0_i32, %c0_i32_0 : i32, i32
  }
  func.func @transform_3(%arg0: i32) -> (i32, i32) {
    %c0_i32 = arith.constant 0 : i32
    %c0_i32_0 = arith.constant 0 : i32
    return %arg0, %c0_i32 : i32, i32
  }
}

module attributes {stable_mosaic.version = 11 : i64} {
  func.func @_conv_relu_pool_kernel(%arg0: i32, %arg1: memref<4x32x256xbf16, #tpu.memory_space<vmem>>, %arg2: memref<256x128xbf16, #tpu.memory_space<vmem>>, %arg3: memref<1x128xf32, #tpu.memory_space<vmem>>, %arg4: memref<32x128xbf16, #tpu.memory_space<vmem>>) attributes {dimension_semantics = [#tpu.dimension_semantics<parallel>], iteration_bounds = array<i64: 2>, scalar_prefetch = 0 : i64, scratch_operands = 0 : i64, tpu.core_type = #tpu.core_type<tc>, window_params = [{transform_indices = @transform_0, window_bounds = array<i64: 4, 32, 256>}, {pipeline_mode = #tpu.pipeline_mode<synchronous>, transform_indices = @transform_1, window_bounds = array<i64: 256, 128>}, {pipeline_mode = #tpu.pipeline_mode<synchronous>, transform_indices = @transform_2, window_bounds = array<i64: 1, 128>}, {transform_indices = @transform_3, window_bounds = array<i64: 32, 128>}]} {
    %c0 = arith.constant 0 : index
    %c0_0 = arith.constant 0 : index
    %c0_1 = arith.constant 0 : index
    %0 = vector.load %arg1[%c0, %c0_0, %c0_1] : memref<4x32x256xbf16, #tpu.memory_space<vmem>>, vector<4x32x256xbf16>
    %1 = vector.shape_cast %0 : vector<4x32x256xbf16> to vector<128x256xbf16>
    %c0_2 = arith.constant 0 : index
    %c0_3 = arith.constant 0 : index
    %2 = vector.load %arg2[%c0_2, %c0_3] : memref<256x128xbf16, #tpu.memory_space<vmem>>, vector<256x128xbf16>
    %cst = arith.constant dense<0.000000e+00> : vector<128x128xf32>
    %3 = tpu.matmul %1, %2, %cst {dimension_numbers = #tpu.dot_dimension_numbers<[1], [0], [0], [1], [0, 0, 1, 1], [], []>} : vector<128x256xbf16>, vector<256x128xbf16>, vector<128x128xf32> -> vector<128x128xf32>
    %4 = vector.shape_cast %3 : vector<128x128xf32> to vector<4x32x128xf32>
    %5 = vector.extract_strided_slice %4 {offsets = [0, 0, 0], sizes = [1, 32, 128], strides = [1, 1, 1]} : vector<4x32x128xf32> to vector<1x32x128xf32>
    %6 = vector.shape_cast %5 : vector<1x32x128xf32> to vector<32x128xf32>
    %7 = vector.extract_strided_slice %4 {offsets = [1, 0, 0], sizes = [1, 32, 128], strides = [1, 1, 1]} : vector<4x32x128xf32> to vector<1x32x128xf32>
    %8 = vector.shape_cast %7 : vector<1x32x128xf32> to vector<32x128xf32>
    %9 = arith.maximumf %6, %8 : vector<32x128xf32>
    %10 = vector.extract_strided_slice %4 {offsets = [2, 0, 0], sizes = [1, 32, 128], strides = [1, 1, 1]} : vector<4x32x128xf32> to vector<1x32x128xf32>
    %11 = vector.shape_cast %10 : vector<1x32x128xf32> to vector<32x128xf32>
    %12 = vector.extract_strided_slice %4 {offsets = [3, 0, 0], sizes = [1, 32, 128], strides = [1, 1, 1]} : vector<4x32x128xf32> to vector<1x32x128xf32>
    %13 = vector.shape_cast %12 : vector<1x32x128xf32> to vector<32x128xf32>
    %14 = arith.maximumf %11, %13 : vector<32x128xf32>
    %15 = arith.maximumf %9, %14 : vector<32x128xf32>
    %c0_4 = arith.constant 0 : index
    %c0_5 = arith.constant 0 : index
    %16 = vector.load %arg3[%c0_4, %c0_5] : memref<1x128xf32, #tpu.memory_space<vmem>>, vector<1x128xf32>
    %17 = vector.broadcast %16 : vector<1x128xf32> to vector<32x128xf32>
    %18 = arith.addf %15, %17 : vector<32x128xf32>
    %cst_6 = arith.constant 0.000000e+00 : f32
    %19 = vector.broadcast %cst_6 : f32 to vector<32x128xf32>
    %20 = arith.maximumf %18, %19 : vector<32x128xf32>
    %21 = arith.truncf %20 : vector<32x128xf32> to vector<32x128xbf16>
    %c0_7 = arith.constant 0 : index
    %c0_8 = arith.constant 0 : index
    %22 = vector.load %arg4[%c0_7, %c0_8] : memref<32x128xbf16, #tpu.memory_space<vmem>>, vector<32x128xbf16>
    tpu.vector_store %arg4[%c0_7, %c0_8], %21 {strides = array<i32>} : memref<32x128xbf16, #tpu.memory_space<vmem>>, vector<32x128xbf16>,
    return
  }
  func.func @transform_0(%arg0: i32) -> (i32, i32, i32) {
    %c0_i32 = arith.constant 0 : i32
    %c0_i32_0 = arith.constant 0 : i32
    %c0_i32_1 = arith.constant 0 : i32
    return %c0_i32, %arg0, %c0_i32_0 : i32, i32, i32
  }
  func.func @transform_1(%arg0: i32) -> (i32, i32) {
    %c0_i32 = arith.constant 0 : i32
    %c0_i32_0 = arith.constant 0 : i32
    %c0_i32_1 = arith.constant 0 : i32
    return %c0_i32, %c0_i32_0 : i32, i32
  }
  func.func @transform_2(%arg0: i32) -> (i32, i32) {
    %c0_i32 = arith.constant 0 : i32
    %c0_i32_0 = arith.constant 0 : i32
    %c0_i32_1 = arith.constant 0 : i32
    return %c0_i32, %c0_i32_0 : i32, i32
  }
  func.func @transform_3(%arg0: i32) -> (i32, i32) {
    %c0_i32 = arith.constant 0 : i32
    %c0_i32_0 = arith.constant 0 : i32
    return %arg0, %c0_i32 : i32, i32
  }
}

module attributes {stable_mosaic.version = 11 : i64} {
  func.func @_fc3_kernel(%arg0: i32, %arg1: memref<16x512xbf16, #tpu.memory_space<vmem>>, %arg2: memref<512x128xbf16, #tpu.memory_space<vmem>>, %arg3: memref<1x128xf32, #tpu.memory_space<vmem>>, %arg4: memref<128x128xbf16, #tpu.memory_space<vmem>>, %arg5: memref<1x128xf32, #tpu.memory_space<vmem>>, %arg6: memref<128x128xbf16, #tpu.memory_space<vmem>>, %arg7: memref<1x128xf32, #tpu.memory_space<vmem>>, %arg8: memref<16x128xf32, #tpu.memory_space<vmem>>) attributes {dimension_semantics = [#tpu.dimension_semantics<parallel>], iteration_bounds = array<i64: 2>, scalar_prefetch = 0 : i64, scratch_operands = 0 : i64, tpu.core_type = #tpu.core_type<tc>, window_params = [{transform_indices = @transform_0, window_bounds = array<i64: 16, 512>}, {pipeline_mode = #tpu.pipeline_mode<synchronous>, transform_indices = @transform_1, window_bounds = array<i64: 512, 128>}, {pipeline_mode = #tpu.pipeline_mode<synchronous>, transform_indices = @transform_2, window_bounds = array<i64: 1, 128>}, {pipeline_mode = #tpu.pipeline_mode<synchronous>, transform_indices = @transform_3, window_bounds = array<i64: 128, 128>}, {pipeline_mode = #tpu.pipeline_mode<synchronous>, transform_indices = @transform_4, window_bounds = array<i64: 1, 128>}, {pipeline_mode = #tpu.pipeline_mode<synchronous>, transform_indices = @transform_5, window_bounds = array<i64: 128, 128>}, {pipeline_mode = #tpu.pipeline_mode<synchronous>, transform_indices = @transform_6, window_bounds = array<i64: 1, 128>}, {transform_indices = @transform_7, window_bounds = array<i64: 16, 128>}]} {
    %c0 = arith.constant 0 : index
    %c0_0 = arith.constant 0 : index
    %0 = vector.load %arg1[%c0, %c0_0] : memref<16x512xbf16, #tpu.memory_space<vmem>>, vector<16x512xbf16>
    %c0_1 = arith.constant 0 : index
    %c0_2 = arith.constant 0 : index
    %1 = vector.load %arg2[%c0_1, %c0_2] : memref<512x128xbf16, #tpu.memory_space<vmem>>, vector<512x128xbf16>
    %cst = arith.constant dense<0.000000e+00> : vector<16x128xf32>
    %2 = tpu.matmul %0, %1, %cst {dimension_numbers = #tpu.dot_dimension_numbers<[1], [0], [0], [1], [0, 0, 1, 1], [], []>} : vector<16x512xbf16>, vector<512x128xbf16>, vector<16x128xf32> -> vector<16x128xf32>
    %c0_3 = arith.constant 0 : index
    %c0_4 = arith.constant 0 : index
    %3 = vector.load %arg3[%c0_3, %c0_4] : memref<1x128xf32, #tpu.memory_space<vmem>>, vector<1x128xf32>
    %4 = vector.broadcast %3 : vector<1x128xf32> to vector<16x128xf32>
    %5 = arith.addf %2, %4 : vector<16x128xf32>
    %cst_5 = arith.constant 0.000000e+00 : f32
    %6 = vector.broadcast %cst_5 : f32 to vector<16x128xf32>
    %7 = arith.maximumf %5, %6 : vector<16x128xf32>
    %8 = arith.truncf %7 : vector<16x128xf32> to vector<16x128xbf16>
    %c0_6 = arith.constant 0 : index
    %c0_7 = arith.constant 0 : index
    %9 = vector.load %arg4[%c0_6, %c0_7] : memref<128x128xbf16, #tpu.memory_space<vmem>>, vector<128x128xbf16>
    %cst_8 = arith.constant dense<0.000000e+00> : vector<16x128xf32>
    %10 = tpu.matmul %8, %9, %cst_8 {dimension_numbers = #tpu.dot_dimension_numbers<[1], [0], [0], [1], [0, 0, 1, 1], [], []>} : vector<16x128xbf16>, vector<128x128xbf16>, vector<16x128xf32> -> vector<16x128xf32>
    %c0_9 = arith.constant 0 : index
    %c0_10 = arith.constant 0 : index
    %11 = vector.load %arg5[%c0_9, %c0_10] : memref<1x128xf32, #tpu.memory_space<vmem>>, vector<1x128xf32>
    %12 = vector.broadcast %11 : vector<1x128xf32> to vector<16x128xf32>
    %13 = arith.addf %10, %12 : vector<16x128xf32>
    %cst_11 = arith.constant 0.000000e+00 : f32
    %14 = vector.broadcast %cst_11 : f32 to vector<16x128xf32>
    %15 = arith.maximumf %13, %14 : vector<16x128xf32>
    %16 = arith.truncf %15 : vector<16x128xf32> to vector<16x128xbf16>
    %c0_12 = arith.constant 0 : index
    %c0_13 = arith.constant 0 : index
    %17 = vector.load %arg6[%c0_12, %c0_13] : memref<128x128xbf16, #tpu.memory_space<vmem>>, vector<128x128xbf16>
    %cst_14 = arith.constant dense<0.000000e+00> : vector<16x128xf32>
    %18 = tpu.matmul %16, %17, %cst_14 {dimension_numbers = #tpu.dot_dimension_numbers<[1], [0], [0], [1], [0, 0, 1, 1], [], []>} : vector<16x128xbf16>, vector<128x128xbf16>, vector<16x128xf32> -> vector<16x128xf32>
    %c0_15 = arith.constant 0 : index
    %c0_16 = arith.constant 0 : index
    %19 = vector.load %arg7[%c0_15, %c0_16] : memref<1x128xf32, #tpu.memory_space<vmem>>, vector<1x128xf32>
    %20 = vector.broadcast %19 : vector<1x128xf32> to vector<16x128xf32>
    %21 = arith.addf %18, %20 : vector<16x128xf32>
    %c0_17 = arith.constant 0 : index
    %c0_18 = arith.constant 0 : index
    %22 = vector.load %arg8[%c0_17, %c0_18] : memref<16x128xf32, #tpu.memory_space<vmem>>, vector<16x128xf32>
    tpu.vector_store %arg8[%c0_17, %c0_18], %21 {strides = array<i32>} : memref<16x128xf32, #tpu.memory_space<vmem>>, vector<16x128xf32>,
    return
  }
  func.func @transform_0(%arg0: i32) -> (i32, i32) {
    %c0_i32 = arith.constant 0 : i32
    %c0_i32_0 = arith.constant 0 : i32
    return %arg0, %c0_i32 : i32, i32
  }
  func.func @transform_1(%arg0: i32) -> (i32, i32) {
    %c0_i32 = arith.constant 0 : i32
    %c0_i32_0 = arith.constant 0 : i32
    %c0_i32_1 = arith.constant 0 : i32
    return %c0_i32, %c0_i32_0 : i32, i32
  }
  func.func @transform_2(%arg0: i32) -> (i32, i32) {
    %c0_i32 = arith.constant 0 : i32
    %c0_i32_0 = arith.constant 0 : i32
    %c0_i32_1 = arith.constant 0 : i32
    return %c0_i32, %c0_i32_0 : i32, i32
  }
  func.func @transform_3(%arg0: i32) -> (i32, i32) {
    %c0_i32 = arith.constant 0 : i32
    %c0_i32_0 = arith.constant 0 : i32
    %c0_i32_1 = arith.constant 0 : i32
    return %c0_i32, %c0_i32_0 : i32, i32
  }
  func.func @transform_4(%arg0: i32) -> (i32, i32) {
    %c0_i32 = arith.constant 0 : i32
    %c0_i32_0 = arith.constant 0 : i32
    %c0_i32_1 = arith.constant 0 : i32
    return %c0_i32, %c0_i32_0 : i32, i32
  }
  func.func @transform_5(%arg0: i32) -> (i32, i32) {
    %c0_i32 = arith.constant 0 : i32
    %c0_i32_0 = arith.constant 0 : i32
    %c0_i32_1 = arith.constant 0 : i32
    return %c0_i32, %c0_i32_0 : i32, i32
  }
  func.func @transform_6(%arg0: i32) -> (i32, i32) {
    %c0_i32 = arith.constant 0 : i32
    %c0_i32_0 = arith.constant 0 : i32
    %c0_i32_1 = arith.constant 0 : i32
    return %c0_i32, %c0_i32_0 : i32, i32
  }
  func.func @transform_7(%arg0: i32) -> (i32, i32) {
    %c0_i32 = arith.constant 0 : i32
    %c0_i32_0 = arith.constant 0 : i32
    return %arg0, %c0_i32 : i32, i32
  }
}

</mosaic_0001>

<bundles_post_ra>
// kernel: lenet_forward.3
= control target key start
LH: loop header
LB: loop body
LE: loop exit
PB: predicated region body
PF: predicated region fallthrough
CT: control target
= control target key end

     0   :  { %s2412_s12 = smov 0   ;;  %s2414_s13 = smov 0   ;;  %s2840_s0 = inlined_call_operand.vmem [shape: bf16[4,416,128], index: 0, kind: input, shape index: {}]   ;;  %s2841_s1 = inlined_call_operand.vmem [shape: bf16[128,128], index: 1, kind: input, shape index: {}]   ;;  %s2842_s2 = inlined_call_operand.vmem [shape: f32[1,128], index: 2, kind: input, shape index: {}]   ;;  %s2843_s3 = inlined_call_operand.vmem [shape: bf16[416,128], index: 3, kind: output, shape index: {}]  }
   0x1   :  { %s2416_s14 = smov 0  }
   0x2 LB: > { %s1886_s15 = sadd.s32 4294967295, %s2390_s14   ;;  %s2429_s16 = sadd.s32 1, %s2390_s14   ;;  %s2390_s14 = sphi %s2416_s14, %s2850_s14   ;;  %s2386_s13 = sphi %s2414_s13, %s2849_s13   ;;  %s2382_s12 = sphi %s2412_s12, %s2848_s12  }
   0x3   : > { %s17_s17 = ssub.s32 %s2390_s14, %s2429_s16  ;;  %s20_s18 = sadd.s32 1, %s2386_s13 }
   0x4   : > { %p18_p0 = scmp.eq.s32.totalorder %s17_s17, 0  ;;  %p27_p1 = scmp.ne.s32.totalorder %s2386_s13, %s2382_s12 }
   0x5   : > { %p28_p2 = scmp.eq.s32.totalorder %s2390_s14, 0  ;;  %p1889_p4 = scmp.ge.s32.totalorder %s2390_s14, 2 }
   0x6   : > { %s2438_s19 = scalar_select %p18_p0, %s2386_s13, %s20_s18  }
   0x7   : > { %p29_p3 = por %p28_p2, %p27_p1  ;;  %127 = sbr.rel (%p1889_p4) target bundleno = 45 (0x2d), region = 24 }
   0xe   : > { %130 = sbr.rel (!%p29_p3) target bundleno = 45 (0x2d), region = 28  ;;  %s132_s20 = sand.u32 (%p29_p3), 1, %s2386_s13  }
   0xf   : > { %s1982_s21 = smul.u32 (%p29_p3), 104, %s2390_s14 }
  0x10   : > { %s2282_s22 = smul.u32 (%p29_p3), 416, %s132_s20 }
  0x11   : > { %s2446_s25 = scalar_lea.vmem (%p29_p3), %s2840_s0, %s1982_s21 }
  0x12   : > { %v153_v0 = vld [vmem:[%s2446_s25] sm:$0xff] (%p29_p3)   ;;  %v157_v1 = vld [vmem:[%s2446_s25 + $0x8] sm:$0xff] (%p29_p3)   ;;  %v161_v2 = vld [vmem:[%s2446_s25 + $0x10] sm:$0xff] (%p29_p3)   ;;  %s2451_s26 = scalar_lea.vmem (%p29_p3), [#allocation2], %s2282_s22 }
  0x13   : > { %154 = vst [vmem:[%s2451_s26] sm:$0xff] (%p29_p3), %v153_v0   ;;  %158 = vst [vmem:[%s2451_s26 + $0x8] sm:$0xff] (%p29_p3), %v157_v1   ;;  %v165_v3 = vld [vmem:[%s2446_s25 + $0x18] sm:$0xff] (%p29_p3)   ;;  %v169_v4 = vld [vmem:[%s2446_s25 + $0x20] sm:$0xff] (%p29_p3)  }
  0x14   : > { %162 = vst [vmem:[%s2451_s26 + $0x10] sm:$0xff] (%p29_p3), %v161_v2   ;;  %v173_v5 = vld [vmem:[%s2446_s25 + $0x28] sm:$0xff] (%p29_p3)   ;;  %166 = vst [vmem:[%s2451_s26 + $0x18] sm:$0xff] (%p29_p3), %v165_v3   ;;  %v177_v6 = vld [vmem:[%s2446_s25 + $0x30] sm:$0xff] (%p29_p3)  }
  0x15   : > { %170 = vst [vmem:[%s2451_s26 + $0x20] sm:$0xff] %v169_v4   ;;  %174 = vst [vmem:[%s2451_s26 + $0x28] sm:$0xff] %v173_v5   ;;  %v181_v7 = vld [vmem:[%s2446_s25 + $0x38] sm:$0xff]   ;;  %v185_v8 = vld [vmem:[%s2446_s25 + $0x40] sm:$0xff]  }
  0x16   : > { %178 = vst [vmem:[%s2451_s26 + $0x30] sm:$0xff] %v177_v6   ;;  %182 = vst [vmem:[%s2451_s26 + $0x38] sm:$0xff] %v181_v7   ;;  %v189_v9 = vld [vmem:[%s2446_s25 + $0x48] sm:$0xff]   ;;  %v193_v10 = vld [vmem:[%s2446_s25 + $0x50] sm:$0xff]  }
  0x17   : > { %186 = vst [vmem:[%s2451_s26 + $0x40] sm:$0xff] %v185_v8   ;;  %v197_v11 = vld [vmem:[%s2446_s25 + $0x58] sm:$0xff]   ;;  %190 = vst [vmem:[%s2451_s26 + $0x48] sm:$0xff] %v189_v9   ;;  %v201_v12 = vld [vmem:[%s2446_s25 + $0x60] sm:$0xff]  }
  0x18   : > { %194 = vst [vmem:[%s2451_s26 + $0x50] sm:$0xff] %v193_v10   ;;  %198 = vst [vmem:[%s2451_s26 + $0x58] sm:$0xff] %v197_v11   ;;  %v205_v13 = vld [vmem:[%s2446_s25 + $0xd0] sm:$0xff]   ;;  %v209_v14 = vld [vmem:[%s2446_s25 + $0xd8] sm:$0xff]  }
  0x19   : > { %202 = vst [vmem:[%s2451_s26 + $0x60] sm:$0xff] %v201_v12   ;;  %206 = vst [vmem:[%s2451_s26 + $0x68] sm:$0xff] %v205_v13   ;;  %v213_v15 = vld [vmem:[%s2446_s25 + $0xe0] sm:$0xff]   ;;  %v217_v16 = vld [vmem:[%s2446_s25 + $0xe8] sm:$0xff]  }
  0x1a   : > { %210 = vst [vmem:[%s2451_s26 + $0x70] sm:$0xff] %v209_v14   ;;  %v221_v17 = vld [vmem:[%s2446_s25 + $0xf0] sm:$0xff]   ;;  %214 = vst [vmem:[%s2451_s26 + $0x78] sm:$0xff] %v213_v15   ;;  %v225_v18 = vld [vmem:[%s2446_s25 + $0xf8] sm:$0xff]  }
  0x1b   : > { %218 = vst [vmem:[%s2451_s26 + $0x80] sm:$0xff] %v217_v16   ;;  %222 = vst [vmem:[%s2451_s26 + $0x88] sm:$0xff] %v221_v17   ;;  %v229_v19 = vld [vmem:[%s2446_s25 + $0x100] sm:$0xff]   ;;  %v233_v20 = vld [vmem:[%s2446_s25 + $0x108] sm:$0xff]  }
  0x1c   : > { %226 = vst [vmem:[%s2451_s26 + $0x90] sm:$0xff] %v225_v18   ;;  %230 = vst [vmem:[%s2451_s26 + $0x98] sm:$0xff] %v229_v19   ;;  %v237_v21 = vld [vmem:[%s2446_s25 + $0x110] sm:$0xff]   ;;  %v241_v22 = vld [vmem:[%s2446_s25 + $0x118] sm:$0xff]  }
  0x1d   : > { %234 = vst [vmem:[%s2451_s26 + $0xa0] sm:$0xff] %v233_v20   ;;  %v245_v23 = vld [vmem:[%s2446_s25 + $0x120] sm:$0xff]   ;;  %238 = vst [vmem:[%s2451_s26 + $0xa8] sm:$0xff] %v237_v21   ;;  %v249_v24 = vld [vmem:[%s2446_s25 + $0x128] sm:$0xff]  }
  0x1e   : > { %242 = vst [vmem:[%s2451_s26 + $0xb0] sm:$0xff] %v241_v22   ;;  %246 = vst [vmem:[%s2451_s26 + $0xb8] sm:$0xff] %v245_v23   ;;  %v253_v25 = vld [vmem:[%s2446_s25 + $0x130] sm:$0xff]   ;;  %v257_v26 = vld [vmem:[%s2446_s25 + $0x1a0] sm:$0xff]  }
  0x1f   : > { %250 = vst [vmem:[%s2451_s26 + $0xc0] sm:$0xff] %v249_v24   ;;  %254 = vst [vmem:[%s2451_s26 + $0xc8] sm:$0xff] %v253_v25   ;;  %v261_v27 = vld [vmem:[%s2446_s25 + $0x1a8] sm:$0xff]   ;;  %v265_v28 = vld [vmem:[%s2446_s25 + $0x1b0] sm:$0xff]  }
  0x20   : > { %258 = vst [vmem:[%s2451_s26 + $0xd0] sm:$0xff] %v257_v26   ;;  %v269_v29 = vld [vmem:[%s2446_s25 + $0x1b8] sm:$0xff]   ;;  %262 = vst [vmem:[%s2451_s26 + $0xd8] sm:$0xff] %v261_v27   ;;  %v273_v30 = vld [vmem:[%s2446_s25 + $0x1c0] sm:$0xff]  }
  0x21   : > { %266 = vst [vmem:[%s2451_s26 + $0xe0] sm:$0xff] %v265_v28   ;;  %270 = vst [vmem:[%s2451_s26 + $0xe8] sm:$0xff] %v269_v29   ;;  %v277_v31 = vld [vmem:[%s2446_s25 + $0x1c8] sm:$0xff]   ;;  %v281_v32 = vld [vmem:[%s2446_s25 + $0x1d0] sm:$0xff]  }
  0x22   : > { %274 = vst [vmem:[%s2451_s26 + $0xf0] sm:$0xff] %v273_v30   ;;  %278 = vst [vmem:[%s2451_s26 + $0xf8] sm:$0xff] %v277_v31   ;;  %v285_v33 = vld [vmem:[%s2446_s25 + $0x1d8] sm:$0xff]   ;;  %v289_v34 = vld [vmem:[%s2446_s25 + $0x1e0] sm:$0xff]  }
  0x23   : > { %282 = vst [vmem:[%s2451_s26 + $0x100] sm:$0xff] %v281_v32   ;;  %v293_v35 = vld [vmem:[%s2446_s25 + $0x1e8] sm:$0xff]   ;;  %286 = vst [vmem:[%s2451_s26 + $0x108] sm:$0xff] %v285_v33   ;;  %v297_v36 = vld [vmem:[%s2446_s25 + $0x1f0] sm:$0xff]  }
  0x24   : > { %290 = vst [vmem:[%s2451_s26 + $0x110] sm:$0xff] %v289_v34   ;;  %294 = vst [vmem:[%s2451_s26 + $0x118] sm:$0xff] %v293_v35   ;;  %v301_v37 = vld [vmem:[%s2446_s25 + $0x1f8] sm:$0xff]   ;;  %v305_v38 = vld [vmem:[%s2446_s25 + $0x200] sm:$0xff]  }
  0x25   : > { %298 = vst [vmem:[%s2451_s26 + $0x120] sm:$0xff] %v297_v36   ;;  %302 = vst [vmem:[%s2451_s26 + $0x128] sm:$0xff] %v301_v37   ;;  %v309_v39 = vld [vmem:[%s2446_s25 + $0x270] sm:$0xff]   ;;  %v313_v40 = vld [vmem:[%s2446_s25 + $0x278] sm:$0xff]  }
  0x26   : > { %306 = vst [vmem:[%s2451_s26 + $0x130] sm:$0xff] %v305_v38   ;;  %v317_v41 = vld [vmem:[%s2446_s25 + $0x280] sm:$0xff]   ;;  %310 = vst [vmem:[%s2451_s26 + $0x138] sm:$0xff] %v309_v39   ;;  %v321_v42 = vld [vmem:[%s2446_s25 + $0x288] sm:$0xff]  }
  0x27   : > { %314 = vst [vmem:[%s2451_s26 + $0x140] sm:$0xff] %v313_v40   ;;  %318 = vst [vmem:[%s2451_s26 + $0x148] sm:$0xff] %v317_v41   ;;  %v325_v43 = vld [vmem:[%s2446_s25 + $0x290] sm:$0xff]   ;;  %v329_v44 = vld [vmem:[%s2446_s25 + $0x298] sm:$0xff]  }
  0x28   : > { %322 = vst [vmem:[%s2451_s26 + $0x150] sm:$0xff] %v321_v42   ;;  %326 = vst [vmem:[%s2451_s26 + $0x158] sm:$0xff] %v325_v43   ;;  %v333_v45 = vld [vmem:[%s2446_s25 + $0x2a0] sm:$0xff]   ;;  %v337_v46 = vld [vmem:[%s2446_s25 + $0x2a8] sm:$0xff]  }
  0x29   : > { %330 = vst [vmem:[%s2451_s26 + $0x160] sm:$0xff] %v329_v44   ;;  %v341_v47 = vld [vmem:[%s2446_s25 + $0x2b0] sm:$0xff]   ;;  %334 = vst [vmem:[%s2451_s26 + $0x168] sm:$0xff] %v333_v45   ;;  %v345_v48 = vld [vmem:[%s2446_s25 + $0x2b8] sm:$0xff]  }
  0x2a   : > { %338 = vst [vmem:[%s2451_s26 + $0x170] sm:$0xff] %v337_v46   ;;  %342 = vst [vmem:[%s2451_s26 + $0x178] sm:$0xff] %v341_v47   ;;  %v349_v49 = vld [vmem:[%s2446_s25 + $0x2c0] sm:$0xff]   ;;  %v353_v50 = vld [vmem:[%s2446_s25 + $0x2c8] sm:$0xff]  }
  0x2b   : > { %346 = vst [vmem:[%s2451_s26 + $0x180] sm:$0xff] %v345_v48   ;;  %350 = vst [vmem:[%s2451_s26 + $0x188] sm:$0xff] %v349_v49   ;;  %v357_v51 = vld [vmem:[%s2446_s25 + $0x2d0] sm:$0xff]  }
  0x2c   : > { %354 = vst [vmem:[%s2451_s26 + $0x190] sm:$0xff] %v353_v50   ;;  %358 = vst [vmem:[%s2451_s26 + $0x198] sm:$0xff] %v357_v51  }
  0x2d PF: > { %p1891_p5 = scmp.ge.s32.totalorder %s2390_s14, 1  ;;  %p590_p6 = scmp.lt.s32.totalorder %s2390_s14, 3 }
  0x2f   : > { %p591_p7 = pnand %p1891_p5, %p590_p6 }
  0x31   : > { %594 = sbr.rel (%p591_p7) target bundleno = 411 (0x19b), region = 69 }
  0x38   : > { %v2308_v52 = vld [vmem:[%s2841_s1] sm:$0xff]   ;;  %s597_s29 = sand.u32 1, %s2382_s12   ;;  %v2309_v53 = vld [vmem:[%s2841_s1 + $0x8] sm:$0xff]   ;;  %v2310_v54 = vld [vmem:[%s2841_s1 + $0x10] sm:$0xff]   ;;  %s621_s24 = smul.u32 26, %s1886_s15 }
  0x39   : > { %s2283_s5 = smul.u32 416, %s597_s29  ;;  %2146 = vmatprep.subr.bf16.mxu0 %v2308_v52  ;;  %2266 = vmatprep.subr.bf16.mxu1 %v2308_v52  ;;  %v2311_v55 = vld [vmem:[%s2841_s1 + $0x18] sm:$0xff]   ;;  %v2312_v58 = vld [vmem:[%s2841_s1 + $0x20] sm:$0xff]   ;;  %v2313_v59 = vld [vmem:[%s2841_s1 + $0x28] sm:$0xff]  }
  0x3a   : > { %2147 = vmatpush3.bf16.msra.mxu0 %v2308_v52  ;;  %2274 = vmatpush3.bf16.msra.mxu1 %v2308_v52  ;;  %v2314_v60 = vld [vmem:[%s2841_s1 + $0x30] sm:$0xff]   ;;  %v2315_v61 = vld [vmem:[%s2841_s1 + $0x38] sm:$0xff]   ;;  %p622_p8 = scmp.lt.s32.totalorder %s621_s24, 51 }
  0x3b   : > { %2148 = vmatprep.subr.bf16.mxu0 %v2309_v53  ;;  %2267 = vmatprep.subr.bf16.mxu1 %v2309_v53  ;;  %s2569_s10 = scalar_lea.vmem [#allocation2], %s2283_s5 }
  0x3c   : > { %v2316_v56 = vld [vmem:[%s2569_s10] sm:$0xff]   ;;  %v2317_v57 = vld [vmem:[%s2569_s10 + $0xd0] sm:$0xff]   ;;  %v2318_v62 = vld [vmem:[%s2569_s10 + $0x8] sm:$0xff]   ;;  %s2852_s24 = smov (!%p622_p8, %s621_s24), 51 }
  0x3d   : > { %2162 = vmatprep.mubr.bf16.mxu0 %v2316_v56  ;;  %2214 = vmatprep.mubr.bf16.mxu1 %v2317_v57  ;;  %v2319_v63 = vld [vmem:[%s2569_s10 + $0xd8] sm:$0xff]   ;;  %v2320_v0 = vld [vmem:[%s2569_s10 + $0x10] sm:$0xff]   ;;  %v2321_v1 = vld [vmem:[%s2569_s10 + $0xe0] sm:$0xff]   ;;  %s1892_s14 = sshll.u32 %s2852_s24, 2 }
  0x3e   : > { %2149 = vmatpush3.bf16.msra.mxu0 %v2309_v53  ;;  %2275 = vmatpush3.bf16.msra.mxu1 %v2309_v53  ;;  %v2322_v2 = vld [vmem:[%s2569_s10 + $0x18] sm:$0xff]   ;;  %v2323_v3 = vld [vmem:[%s2569_s10 + $0xe8] sm:$0xff]   ;;  %v2324_v4 = vld [vmem:[%s2569_s10 + $0x20] sm:$0xff]   ;;  %s2745_s28 = scalar_lea.vmem %s2843_s3, %s1892_s14 }
  0x3f   : > { %2150 = vmatprep.subr.bf16.mxu0 %v2310_v54  ;;  %2268 = vmatprep.subr.bf16.mxu1 %v2310_v54  ;;  %v2325_v5 = vld [vmem:[%s2569_s10 + $0xf0] sm:$0xff]   ;;  %v2326_v6 = vld [vmem:[%s2569_s10 + $0x28] sm:$0xff]   ;;  %v2327_v7 = vld [vmem:[%s2569_s10 + $0xf8] sm:$0xff]  }
  0x40   : > { %v2328_v8 = vld [vmem:[%s2569_s10 + $0x30] sm:$0xff]   ;;  %v2329_v9 = vld [vmem:[%s2569_s10 + $0x100] sm:$0xff]   ;;  %v2330_v10 = vld [vmem:[%s2569_s10 + $0x38] sm:$0xff]  }
  0x41   : > { %v2331_v11 = vld [vmem:[%s2569_s10 + $0x108] sm:$0xff]   ;;  %v2332_v12 = vld [vmem:[%s2569_s10 + $0x40] sm:$0xff]   ;;  %v2333_v13 = vld [vmem:[%s2569_s10 + $0x110] sm:$0xff]  }
  0x42   : > { %2151 = vmatpush3.bf16.msra.mxu0 %v2310_v54  ;;  %2276 = vmatpush3.bf16.msra.mxu1 %v2310_v54  ;;  %v2334_v14 = vld [vmem:[%s2569_s10 + $0x48] sm:$0xff]   ;;  %v2335_v15 = vld [vmem:[%s2569_s10 + $0x118] sm:$0xff]   ;;  %v2336_v16 = vld [vmem:[%s2569_s10 + $0x50] sm:$0xff]  }
  0x43   : > { %2152 = vmatprep.subr.bf16.mxu0 %v2311_v55  ;;  %2269 = vmatprep.subr.bf16.mxu1 %v2311_v55  ;;  %v2337_v17 = vld [vmem:[%s2569_s10 + $0x120] sm:$0xff]   ;;  %v2338_v18 = vld [vmem:[%s2569_s10 + $0x58] sm:$0xff]   ;;  %v2339_v19 = vld [vmem:[%s2569_s10 + $0x128] sm:$0xff]  }
  0x44   : > { %v2340_v20 = vld [vmem:[%s2569_s10 + $0x60] sm:$0xff]   ;;  %v2341_v21 = vld [vmem:[%s2569_s10 + $0x130] sm:$0xff]   ;;  %v2342_v22 = vld [vmem:[%s2569_s10 + $0x68] sm:$0xff]  }
  0x45   : > { %v2343_v23 = vld [vmem:[%s2569_s10 + $0x138] sm:$0xff]   ;;  %v2344_v24 = vld [vmem:[%s2569_s10 + $0x70] sm:$0xff]   ;;  %v2345_v25 = vld [vmem:[%s2569_s10 + $0x140] sm:$0xff]  }
  0x46   : > { %2153 = vmatpush3.bf16.msra.mxu0 %v2311_v55  ;;  %2277 = vmatpush3.bf16.msra.mxu1 %v2311_v55  ;;  %v2346_v26 = vld [vmem:[%s2569_s10 + $0x78] sm:$0xff]   ;;  %v2347_v27 = vld [vmem:[%s2569_s10 + $0x148] sm:$0xff]   ;;  %v2348_v28 = vld [vmem:[%s2569_s10 + $0x80] sm:$0xff]  }
  0x47   : > { %2154 = vmatprep.subr.bf16.mxu0 %v2312_v58  ;;  %2270 = vmatprep.subr.bf16.mxu1 %v2312_v58  ;;  %v2349_v29 = vld [vmem:[%s2569_s10 + $0x150] sm:$0xff]   ;;  %v2350_v30 = vld [vmem:[%s2569_s10 + $0x88] sm:$0xff]   ;;  %v2351_v31 = vld [vmem:[%s2569_s10 + $0x158] sm:$0xff]  }
  0x48   : > { %v2352_v32 = vld [vmem:[%s2569_s10 + $0x90] sm:$0xff]   ;;  %v2353_v33 = vld [vmem:[%s2569_s10 + $0x160] sm:$0xff]   ;;  %v2354_v34 = vld [vmem:[%s2569_s10 + $0x98] sm:$0xff]  }
  0x49   : > { %v2355_v35 = vld [vmem:[%s2569_s10 + $0x168] sm:$0xff]   ;;  %v2356_v36 = vld [vmem:[%s2569_s10 + $0xa0] sm:$0xff]   ;;  %v2357_v37 = vld [vmem:[%s2569_s10 + $0x170] sm:$0xff]  }
  0x4a   : > { %2155 = vmatpush3.bf16.msra.mxu0 %v2312_v58  ;;  %2278 = vmatpush3.bf16.msra.mxu1 %v2312_v58  ;;  %v2358_v38 = vld [vmem:[%s2569_s10 + $0xa8] sm:$0xff]   ;;  %v2359_v39 = vld [vmem:[%s2569_s10 + $0x178] sm:$0xff]   ;;  %v2360_v40 = vld [vmem:[%s2569_s10 + $0xb0] sm:$0xff]  }
  0x4b   : > { %2156 = vmatprep.subr.bf16.mxu0 %v2313_v59  ;;  %2271 = vmatprep.subr.bf16.mxu1 %v2313_v59  ;;  %v2361_v41 = vld [vmem:[%s2569_s10 + $0x180] sm:$0xff]   ;;  %v2362_v42 = vld [vmem:[%s2569_s10 + $0xb8] sm:$0xff]   ;;  %v2363_v43 = vld [vmem:[%s2569_s10 + $0x188] sm:$0xff]  }
  0x4c   : > { %v2364_v44 = vld [vmem:[%s2569_s10 + $0xc0] sm:$0xff]   ;;  %v2365_v45 = vld [vmem:[%s2569_s10 + $0x190] sm:$0xff]   ;;  %v2366_v46 = vld [vmem:[%s2569_s10 + $0xc8] sm:$0xff]  }
  0x4d   : > { %v2367_v47 = vld [vmem:[%s2569_s10 + $0x198] sm:$0xff]  }
  0x4e   : > { %2157 = vmatpush3.bf16.msra.mxu0 %v2313_v59  ;;  %2279 = vmatpush3.bf16.msra.mxu1 %v2313_v59 }
  0x4f   : > { %2158 = vmatprep.subr.bf16.mxu0 %v2314_v60  ;;  %2272 = vmatprep.subr.bf16.mxu1 %v2314_v60 }
  0x52   : > { %2159 = vmatpush3.bf16.msra.mxu0 %v2314_v60  ;;  %2280 = vmatpush3.bf16.msra.mxu1 %v2314_v60 }
  0x53   : > { %2160 = vmatprep.subr.bf16.mxu0 %v2315_v61  ;;  %2273 = vmatprep.subr.bf16.mxu1 %v2315_v61 }
  0x56   : > { %2161 = vmatpush3.bf16.msra.mxu0 %v2315_v61  ;;  %2281 = vmatpush3.bf16.msra.mxu1 %v2315_v61 }
  0x59   : > { %2163 = vmatmul.mubr.bf16.vlgmr.msra.gmra.mrb[0].mxu0 %v2318_v62  ;;  %2215 = vmatmul.mubr.bf16.vlgmr.msra.gmra.mrb[0].mxu1 %v2319_v63 }
  0x5a   : > { %2166 = vmatprep.mubr.bf16.mxu0 %v2320_v0  ;;  %2218 = vmatprep.mubr.bf16.mxu1 %v2321_v1 }
  0x61   : > { %2167 = vmatmul.mubr.bf16.gmra.mrb[4].mxu0 %v2322_v2  ;;  %2219 = vmatmul.mubr.bf16.gmra.mrb[4].mxu1 %v2323_v3 }
  0x62   : > { %2170 = vmatprep.mubr.bf16.mxu0 %v2324_v4  ;;  %2222 = vmatprep.mubr.bf16.mxu1 %v2325_v5 }
  0x69   : > { %2171 = vmatmul.mubr.bf16.gmra.mrb[8].mxu0 %v2326_v6  ;;  %2223 = vmatmul.mubr.bf16.gmra.mrb[8].mxu1 %v2327_v7 }
  0x6a   : > { %2174 = vmatprep.mubr.bf16.mxu0 %v2328_v8  ;;  %2226 = vmatprep.mubr.bf16.mxu1 %v2329_v9 }
  0x71   : > { %2175 = vmatmul.mubr.bf16.gmra.mrb[12].mxu0 %v2330_v10  ;;  %2227 = vmatmul.mubr.bf16.gmra.mrb[12].mxu1 %v2331_v11 }
  0x72   : > { %2178 = vmatprep.mubr.bf16.mxu0 %v2332_v12  ;;  %2230 = vmatprep.mubr.bf16.mxu1 %v2333_v13 }
  0x79   : > { %2179 = vmatmul.mubr.bf16.gmra.mrb[16].mxu0 %v2334_v14  ;;  %2231 = vmatmul.mubr.bf16.gmra.mrb[16].mxu1 %v2335_v15 }
  0x7a   : > { %2182 = vmatprep.mubr.bf16.mxu0 %v2336_v16  ;;  %2234 = vmatprep.mubr.bf16.mxu1 %v2337_v17 }
  0x81   : > { %2183 = vmatmul.mubr.bf16.gmra.mrb[20].mxu0 %v2338_v18  ;;  %2235 = vmatmul.mubr.bf16.gmra.mrb[20].mxu1 %v2339_v19 }
  0x82   : > { %2186 = vmatprep.mubr.bf16.mxu0 %v2340_v20  ;;  %2238 = vmatprep.mubr.bf16.mxu1 %v2341_v21 }
  0x89   : > { %2187 = vmatmul.mubr.bf16.gmra.mrb[24].mxu0 %v2342_v22  ;;  %2239 = vmatmul.mubr.bf16.gmra.mrb[24].mxu1 %v2343_v23 }
  0x8a   : > { %2190 = vmatprep.mubr.bf16.mxu0 %v2344_v24  ;;  %2242 = vmatprep.mubr.bf16.mxu1 %v2345_v25 }
  0x91   : > { %2191 = vmatmul.mubr.bf16.gmra.mrb[28].mxu0 %v2346_v26  ;;  %2243 = vmatmul.mubr.bf16.gmra.mrb[28].mxu1 %v2347_v27 }
  0x92   : > { %2194 = vmatprep.mubr.bf16.mxu0 %v2348_v28  ;;  %2246 = vmatprep.mubr.bf16.mxu1 %v2349_v29 }
  0x99   : > { %2195 = vmatmul.mubr.bf16.gmra.mrb[32].mxu0 %v2350_v30  ;;  %2247 = vmatmul.mubr.bf16.gmra.mrb[32].mxu1 %v2351_v31 }
  0x9a   : > { %2198 = vmatprep.mubr.bf16.mxu0 %v2352_v32  ;;  %2250 = vmatprep.mubr.bf16.mxu1 %v2353_v33 }
  0xa1   : > { %2199 = vmatmul.mubr.bf16.gmra.mrb[36].mxu0 %v2354_v34  ;;  %2251 = vmatmul.mubr.bf16.gmra.mrb[36].mxu1 %v2355_v35 }
  0xa2   : > { %2202 = vmatprep.mubr.bf16.mxu0 %v2356_v36  ;;  %2254 = vmatprep.mubr.bf16.mxu1 %v2357_v37 }
  0xa9   : > { %2203 = vmatmul.mubr.bf16.gmra.mrb[40].mxu0 %v2358_v38  ;;  %2255 = vmatmul.mubr.bf16.gmra.mrb[40].mxu1 %v2359_v39  ;;  %v2732_v38 = vld [vmem:[%s2842_s2] ss:$0 sm:$0xff] }
  0xaa   : > { %2206 = vmatprep.mubr.bf16.mxu0 %v2360_v40  ;;  %2258 = vmatprep.mubr.bf16.mxu1 %v2361_v41 }
  0xb1   : > { %2207 = vmatmul.mubr.bf16.gmra.mrb[44].mxu0 %v2362_v42  ;;  %2259 = vmatmul.mubr.bf16.gmra.mrb[44].mxu1 %v2363_v43 }
  0xb2   : > { %2210 = vmatprep.mubr.bf16.mxu0 %v2364_v44  ;;  %2262 = vmatprep.mubr.bf16.mxu1 %v2365_v45 }
  0xb9   : > { %2211 = vmatmul.mubr.bf16.gmra.mrb[48].mxu0 %v2366_v46  ;;  %2263 = vmatmul.mubr.bf16.gmra.mrb[48].mxu1 %v2367_v47 }
 0x12c   : > { %v2635_v48 = vpop.f32.mrb[0].mxu0  ;;  %v2637_v49 = vpop.f32.mrb[0].mxu1 }
 0x12d   : > { %v1142_v50 = vpop.f32.mrb[1].mxu0  ;;  %v1350_v51 = vpop.f32.mrb[1].mxu1 }
 0x12e   : > { %v2639_v52 = vpop.f32.mrb[2].mxu0  ;;  %v2641_v53 = vpop.f32.mrb[2].mxu1 }
 0x12f   : > { %v1145_v54 = vpop.f32.mrb[3].mxu0  ;;  %v1353_v55 = vpop.f32.mrb[3].mxu1 }
 0x134   : > { %v2643_v56 = vpop.f32.mrb[4].mxu0  ;;  %v2645_v57 = vpop.f32.mrb[4].mxu1 }
 0x135   : > { %v2647_v58 = vpop.f32.mrb[5].mxu0  ;;  %v2649_v59 = vpop.f32.mrb[5].mxu1 }
 0x136   : > { %v2651_v60 = vpop.f32.mrb[6].mxu0  ;;  %v2653_v61 = vpop.f32.mrb[6].mxu1 }
 0x137   : > { %v2655_v62 = vpop.f32.mrb[7].mxu0  ;;  %v2657_v63 = vpop.f32.mrb[7].mxu1 }
 0x13c   : > { %v2659_v0 = vpop.f32.mrb[8].mxu0  ;;  %v2661_v1 = vpop.f32.mrb[8].mxu1 }
 0x13d   : > { %v2663_v2 = vpop.f32.mrb[9].mxu0  ;;  %v2665_v3 = vpop.f32.mrb[9].mxu1 }
 0x13e   : > { %v2667_v4 = vpop.f32.mrb[10].mxu0  ;;  %v2669_v5 = vpop.f32.mrb[10].mxu1 }
 0x13f   : > { %v2671_v6 = vpop.f32.mrb[11].mxu0  ;;  %v2673_v7 = vpop.f32.mrb[11].mxu1 }
 0x144   : > { %v2675_v8 = vpop.f32.mrb[12].mxu0  ;;  %v2677_v9 = vpop.f32.mrb[12].mxu1 }
 0x145   : > { %v2679_v10 = vpop.f32.mrb[13].mxu0  ;;  %v2681_v11 = vpop.f32.mrb[13].mxu1 }
 0x146   : > { %v2683_v12 = vpop.f32.mrb[14].mxu0  ;;  %v2685_v13 = vpop.f32.mrb[14].mxu1 }
 0x147   : > { %v2687_v14 = vpop.f32.mrb[15].mxu0  ;;  %v2689_v15 = vpop.f32.mrb[15].mxu1 }
 0x14c   : > { %v2691_v16 = vpop.f32.mrb[16].mxu0  ;;  %v2693_v17 = vpop.f32.mrb[16].mxu1 }
 0x14d   : > { %v2695_v18 = vpop.f32.mrb[17].mxu0  ;;  %v2697_v19 = vpop.f32.mrb[17].mxu1 }
 0x14e   : > { %v2699_v20 = vpop.f32.mrb[18].mxu0  ;;  %v2701_v21 = vpop.f32.mrb[18].mxu1 }
 0x14f   : > { %v2703_v22 = vpop.f32.mrb[19].mxu0  ;;  %v2705_v23 = vpop.f32.mrb[19].mxu1 }
 0x154   : > { %v2707_v24 = vpop.f32.mrb[20].mxu0  ;;  %v2709_v25 = vpop.f32.mrb[20].mxu1 }
 0x155   : > { %v2711_v26 = vpop.f32.mrb[21].mxu0  ;;  %v2713_v27 = vpop.f32.mrb[21].mxu1 }
 0x156   : > { %v2715_v28 = vpop.f32.mrb[22].mxu0  ;;  %v2717_v29 = vpop.f32.mrb[22].mxu1 }
 0x157   : > { %2844 = vst [vmem:[#allocation3_spill] sm:$0xff] %v2715_v28  ;;  %2845 = vst [vmem:[#allocation4_spill] sm:$0xff] %v2717_v29  ;;  %v2719_v30 = vpop.f32.mrb[23].mxu0  ;;  %v2721_v31 = vpop.f32.mrb[23].mxu1 }
 0x15c   : > { %v2188_v32 = vpop.f32.mrb[24].mxu0  ;;  %v2240_v33 = vpop.f32.mrb[24].mxu1 }
 0x15d   : > { %v1557_v34 = vmax.f32 %v1142_v50, %v2188_v32  ;;  %v1583_v35 = vmax.f32 %v1350_v51, %v2240_v33  ;;  %v2725_v36 = vpop.f32.mrb[25].mxu0  ;;  %v2727_v37 = vpop.f32.mrb[25].mxu1 }
 0x15e   : > { %v2189_v39 = vpop.f32.mrb[26].mxu0  ;;  %v2241_v40 = vpop.f32.mrb[26].mxu1 }
 0x15f   : > { %v1609_v41 = vmax.f32 %v1557_v34, %v1583_v35  ;;  %v1558_v42 = vmax.f32 %v1145_v54, %v2189_v39  ;;  %v1584_v43 = vmax.f32 %v1353_v55, %v2241_v40  ;;  %v2734_v44 = vpop.f32.mrb[27].mxu0  ;;  %v2736_v45 = vpop.f32.mrb[27].mxu1 }
 0x161   : > { %v1642_v46 = vadd.f32 %v2732_v38, %v1609_v41  ;;  %v1610_v47 = vmax.f32 %v1558_v42, %v1584_v43 }
 0x163   : > { %v1643_v50 = vadd.f32 %v2732_v38, %v1610_v47  ;;  %v1668_v33 = vmax.f32 %v1642_v46, 0.0 }
 0x164   : > { %v2192_v51 = vpop.f32.mrb[28].mxu0  ;;  %v2244_v32 = vpop.f32.mrb[28].mxu1 }
 0x165   : > { %v1669_v29 = vmax.f32 %v1643_v50, 0.0  ;;  %v1561_v28 = vmax.f32 %v2647_v58, %v2192_v51  ;;  %v1587_v54 = vmax.f32 %v2649_v59, %v2244_v32  ;;  %v1254_v34 = vpop.f32.mrb[29].mxu0  ;;  %v1462_v55 = vpop.f32.mrb[29].mxu1 }
 0x166   : > { %v1559_v35 = vmax.f32 %v2635_v48, %v1254_v34  ;;  %v1585_v39 = vmax.f32 %v2637_v49, %v1462_v55  ;;  %v2193_v40 = vpop.f32.mrb[30].mxu0  ;;  %v2245_v41 = vpop.f32.mrb[30].mxu1 }
 0x167   : > { %v2012_v42 = vpack.c.bf16 %v1669_v29, %v1668_v33  ;;  %v1613_v43 = vmax.f32 %v1561_v28, %v1587_v54  ;;  %v1562_v58 = vmax.f32 %v2655_v62, %v2193_v40  ;;  %v1588_v59 = vmax.f32 %v2657_v63, %v2245_v41  ;;  %v1257_v46 = vpop.f32.mrb[31].mxu0  ;;  %v1465_v47 = vpop.f32.mrb[31].mxu1 }
 0x168   : > { %v1611_v50 = vmax.f32 %v1559_v35, %v1585_v39  ;;  %v1560_v51 = vmax.f32 %v2639_v52, %v1257_v46  ;;  %v1586_v32 = vmax.f32 %v2641_v53, %v1465_v47 }
 0x169   : > { %2013 = vst [vmem:[%s2745_s28] sm:$0xff] %v2012_v42   ;;  %v1646_v48 = vadd.f32 %v2732_v38, %v1613_v43  ;;  %v1614_v34 = vmax.f32 %v1562_v58, %v1588_v59 }
 0x16a   : > { %v1644_v49 = vadd.f32 %v2732_v38, %v1611_v50  ;;  %v1612_v55 = vmax.f32 %v1560_v51, %v1586_v32 }
 0x16b   : > { %v1647_v28 = vadd.f32 %v2732_v38, %v1614_v34  ;;  %v1672_v33 = vmax.f32 %v1646_v48, 0.0 }
 0x16c   : > { %v1645_v62 = vadd.f32 %v2732_v38, %v1612_v55  ;;  %v2196_v29 = vpop.f32.mrb[32].mxu0  ;;  %v2248_v63 = vpop.f32.mrb[32].mxu1  ;;  %v1670_v40 = vmax.f32 %v1644_v49, 0.0 }
 0x16d   : > { %v1673_v54 = vmax.f32 %v1647_v28, 0.0  ;;  %v1565_v35 = vmax.f32 %v2663_v2, %v2196_v29  ;;  %v1591_v52 = vmax.f32 %v2665_v3, %v2248_v63  ;;  %v1270_v53 = vpop.f32.mrb[33].mxu0  ;;  %v1478_v39 = vpop.f32.mrb[33].mxu1 }
 0x16e   : > { %v1671_v41 = vmax.f32 %v1645_v62, 0.0  ;;  %v1563_v42 = vmax.f32 %v2643_v56, %v1270_v53  ;;  %v1589_v43 = vmax.f32 %v2645_v57, %v1478_v39  ;;  %v2197_v58 = vpop.f32.mrb[34].mxu0  ;;  %v2249_v59 = vpop.f32.mrb[34].mxu1 }
 0x16f   : > { %v2022_v46 = vpack.c.bf16 %v1673_v54, %v1672_v33  ;;  %v1617_v47 = vmax.f32 %v1565_v35, %v1591_v52  ;;  %v1566_v50 = vmax.f32 %v2671_v6, %v2197_v58  ;;  %v1592_v2 = vmax.f32 %v2673_v7, %v2249_v59  ;;  %v1273_v51 = vpop.f32.mrb[35].mxu0  ;;  %v1481_v3 = vpop.f32.mrb[35].mxu1 }
 0x170   : > { %v2017_v32 = vpack.c.bf16 %v1671_v41, %v1670_v40  ;;  %v1615_v48 = vmax.f32 %v1563_v42, %v1589_v43  ;;  %v1564_v34 = vmax.f32 %v2651_v60, %v1273_v51  ;;  %v1590_v49 = vmax.f32 %v2653_v61, %v1481_v3 }
 0x171   : > { %2075 = vst [vmem:[%s2745_s28 + $0x10] sm:$0xff] %v2022_v46   ;;  %v1650_v56 = vadd.f32 %v2732_v38, %v1617_v47  ;;  %v1618_v57 = vmax.f32 %v1566_v50, %v1592_v2 }
 0x172   : > { %2074 = vst [vmem:[%s2745_s28 + $0x8] sm:$0xff] %v2017_v32   ;;  %v1648_v55 = vadd.f32 %v2732_v38, %v1615_v48  ;;  %v1616_v28 = vmax.f32 %v1564_v34, %v1590_v49 }
 0x173   : > { %v1651_v6 = vadd.f32 %v2732_v38, %v1618_v57  ;;  %v1676_v63 = vmax.f32 %v1650_v56, 0.0 }
 0x174   : > { %v1649_v7 = vadd.f32 %v2732_v38, %v1616_v28  ;;  %v2200_v62 = vpop.f32.mrb[36].mxu0  ;;  %v2252_v29 = vpop.f32.mrb[36].mxu1  ;;  %v1674_v52 = vmax.f32 %v1648_v55, 0.0 }
 0x175   : > { %v1677_v33 = vmax.f32 %v1651_v6, 0.0  ;;  %v1569_v60 = vmax.f32 %v2679_v10, %v2200_v62  ;;  %v1595_v61 = vmax.f32 %v2681_v11, %v2252_v29  ;;  %v1286_v54 = vpop.f32.mrb[37].mxu0  ;;  %v1494_v35 = vpop.f32.mrb[37].mxu1 }
 0x176   : > { %v1675_v53 = vmax.f32 %v1649_v7, 0.0  ;;  %v1567_v39 = vmax.f32 %v2659_v0, %v1286_v54  ;;  %v1593_v40 = vmax.f32 %v2661_v1, %v1494_v35  ;;  %v2201_v41 = vpop.f32.mrb[38].mxu0  ;;  %v2253_v42 = vpop.f32.mrb[38].mxu1 }
 0x177   : > { %v2032_v43 = vpack.c.bf16 %v1677_v33, %v1676_v63  ;;  %v1621_v58 = vmax.f32 %v1569_v60, %v1595_v61  ;;  %v1570_v59 = vmax.f32 %v2687_v14, %v2201_v41  ;;  %v1596_v10 = vmax.f32 %v2689_v15, %v2253_v42  ;;  %v1289_v46 = vpop.f32.mrb[39].mxu0  ;;  %v1497_v11 = vpop.f32.mrb[39].mxu1 }
 0x178   : > { %v2027_v47 = vpack.c.bf16 %v1675_v53, %v1674_v52  ;;  %v1619_v50 = vmax.f32 %v1567_v39, %v1593_v40  ;;  %v1568_v2 = vmax.f32 %v2667_v4, %v1289_v46  ;;  %v1594_v51 = vmax.f32 %v2669_v5, %v1497_v11 }
 0x179   : > { %2077 = vst [vmem:[%s2745_s28 + $0x20] sm:$0xff] %v2032_v43   ;;  %v1654_v0 = vadd.f32 %v2732_v38, %v1621_v58  ;;  %v1622_v1 = vmax.f32 %v1570_v59, %v1596_v10 }
 0x17a   : > { %2076 = vst [vmem:[%s2745_s28 + $0x18] sm:$0xff] %v2027_v47   ;;  %v1652_v3 = vadd.f32 %v2732_v38, %v1619_v50  ;;  %v1620_v32 = vmax.f32 %v1568_v2, %v1594_v51 }
 0x17b   : > { %v1655_v14 = vadd.f32 %v2732_v38, %v1622_v1  ;;  %v1680_v49 = vmax.f32 %v1654_v0, 0.0 }
 0x17c   : > { %v1653_v15 = vadd.f32 %v2732_v38, %v1620_v32  ;;  %v2204_v48 = vpop.f32.mrb[40].mxu0  ;;  %v2256_v34 = vpop.f32.mrb[40].mxu1  ;;  %v1678_v28 = vmax.f32 %v1652_v3, 0.0 }
 0x17d   : > { %v1681_v56 = vmax.f32 %v1655_v14, 0.0  ;;  %v1573_v4 = vmax.f32 %v2695_v18, %v2204_v48  ;;  %v1599_v5 = vmax.f32 %v2697_v19, %v2256_v34  ;;  %v1302_v57 = vpop.f32.mrb[41].mxu0  ;;  %v1510_v55 = vpop.f32.mrb[41].mxu1 }
 0x17e   : > { %v1679_v6 = vmax.f32 %v1653_v15, 0.0  ;;  %v1571_v7 = vmax.f32 %v2675_v8, %v1302_v57  ;;  %v1597_v62 = vmax.f32 %v2677_v9, %v1510_v55  ;;  %v2205_v29 = vpop.f32.mrb[42].mxu0  ;;  %v2257_v63 = vpop.f32.mrb[42].mxu1 }
 0x17f   : > { %v2042_v33 = vpack.c.bf16 %v1681_v56, %v1680_v49  ;;  %v1625_v60 = vmax.f32 %v1573_v4, %v1599_v5  ;;  %v1574_v61 = vmax.f32 %v2703_v22, %v2205_v29  ;;  %v1600_v18 = vmax.f32 %v2705_v23, %v2257_v63  ;;  %v1305_v54 = vpop.f32.mrb[43].mxu0  ;;  %v1513_v19 = vpop.f32.mrb[43].mxu1 }
 0x180   : > { %v2037_v35 = vpack.c.bf16 %v1679_v6, %v1678_v28  ;;  %v1623_v52 = vmax.f32 %v1571_v7, %v1597_v62  ;;  %v1572_v53 = vmax.f32 %v2683_v12, %v1305_v54  ;;  %v1598_v39 = vmax.f32 %v2685_v13, %v1513_v19 }
 0x181   : > { %2079 = vst [vmem:[%s2745_s28 + $0x30] sm:$0xff] %v2042_v33   ;;  %v1658_v8 = vadd.f32 %v2732_v38, %v1625_v60  ;;  %v1626_v9 = vmax.f32 %v1574_v61, %v1600_v18 }
 0x182   : > { %2078 = vst [vmem:[%s2745_s28 + $0x28] sm:$0xff] %v2037_v35   ;;  %v1656_v40 = vadd.f32 %v2732_v38, %v1623_v52  ;;  %v1624_v41 = vmax.f32 %v1572_v53, %v1598_v39  ;;  %v2846_v39 = vld [vmem:[#allocation3_spill] sm:$0xff] }
 0x183   : > { %v1659_v22 = vadd.f32 %v2732_v38, %v1626_v9  ;;  %v1684_v58 = vmax.f32 %v1658_v8, 0.0  ;;  %v2847_v9 = vld [vmem:[#allocation4_spill] sm:$0xff] }
 0x184   : > { %v1657_v23 = vadd.f32 %v2732_v38, %v1624_v41  ;;  %v2208_v42 = vpop.f32.mrb[44].mxu0  ;;  %v2260_v43 = vpop.f32.mrb[44].mxu1  ;;  %v1682_v11 = vmax.f32 %v1656_v40, 0.0 }
 0x185   : > { %v1685_v59 = vmax.f32 %v1659_v22, 0.0  ;;  %v1577_v12 = vmax.f32 %v2711_v26, %v2208_v42  ;;  %v1603_v13 = vmax.f32 %v2713_v27, %v2260_v43  ;;  %v1318_v10 = vpop.f32.mrb[45].mxu0  ;;  %v1526_v46 = vpop.f32.mrb[45].mxu1 }
 0x186   : > { %v1683_v47 = vmax.f32 %v1657_v23, 0.0  ;;  %v1575_v50 = vmax.f32 %v2691_v16, %v1318_v10  ;;  %v1601_v2 = vmax.f32 %v2693_v17, %v1526_v46  ;;  %v2209_v51 = vpop.f32.mrb[46].mxu0  ;;  %v2261_v0 = vpop.f32.mrb[46].mxu1 }
 0x187   : > { %v2052_v1 = vpack.c.bf16 %v1685_v59, %v1684_v58  ;;  %v1629_v3 = vmax.f32 %v1577_v12, %v1603_v13  ;;  %v1578_v32 = vmax.f32 %v2719_v30, %v2209_v51  ;;  %v1604_v26 = vmax.f32 %v2721_v31, %v2261_v0  ;;  %v1321_v14 = vpop.f32.mrb[47].mxu0  ;;  %v1529_v27 = vpop.f32.mrb[47].mxu1 }
 0x188   : > { %v2047_v15 = vpack.c.bf16 %v1683_v47, %v1682_v11  ;;  %v1627_v48 = vmax.f32 %v1575_v50, %v1601_v2  ;;  %v1576_v34 = vmax.f32 %v2699_v20, %v1321_v14  ;;  %v1602_v49 = vmax.f32 %v2701_v21, %v1529_v27 }
 0x189   : > { %2081 = vst [vmem:[%s2745_s28 + $0x40] sm:$0xff] %v2052_v1   ;;  %v1662_v16 = vadd.f32 %v2732_v38, %v1629_v3  ;;  %v1630_v17 = vmax.f32 %v1578_v32, %v1604_v26 }
 0x18a   : > { %2080 = vst [vmem:[%s2745_s28 + $0x38] sm:$0xff] %v2047_v15   ;;  %v1660_v56 = vadd.f32 %v2732_v38, %v1627_v48  ;;  %v1628_v4 = vmax.f32 %v1576_v34, %v1602_v49 }
 0x18b   : > { %v1663_v30 = vadd.f32 %v2732_v38, %v1630_v17  ;;  %v1688_v55 = vmax.f32 %v1662_v16, 0.0 }
 0x18c   : > { %v1661_v31 = vadd.f32 %v2732_v38, %v1628_v4  ;;  %v2212_v5 = vpop.f32.mrb[48].mxu0  ;;  %v2264_v57 = vpop.f32.mrb[48].mxu1  ;;  %v1686_v62 = vmax.f32 %v1660_v56, 0.0 }
 0x18d   : > { %v1689_v28 = vmax.f32 %v1663_v30, 0.0  ;;  %v1581_v20 = vmax.f32 %v2725_v36, %v2212_v5  ;;  %v1607_v21 = vmax.f32 %v2727_v37, %v2264_v57  ;;  %v1334_v6 = vpop.f32.mrb[49].mxu0  ;;  %v1542_v7 = vpop.f32.mrb[49].mxu1 }
 0x18e   : > { %v1687_v29 = vmax.f32 %v1661_v31, 0.0  ;;  %v1579_v63 = vmax.f32 %v2707_v24, %v1334_v6  ;;  %v1605_v33 = vmax.f32 %v2709_v25, %v1542_v7  ;;  %v2213_v60 = vpop.f32.mrb[50].mxu0  ;;  %v2265_v61 = vpop.f32.mrb[50].mxu1 }
 0x18f   : > { %v2062_v18 = vpack.c.bf16 %v1689_v28, %v1688_v55  ;;  %v1633_v54 = vmax.f32 %v1581_v20, %v1607_v21  ;;  %v1582_v19 = vmax.f32 %v2734_v44, %v2213_v60  ;;  %v1608_v36 = vmax.f32 %v2736_v45, %v2265_v61  ;;  %v1337_v35 = vpop.f32.mrb[51].mxu0  ;;  %v1545_v37 = vpop.f32.mrb[51].mxu1 }
 0x190   : > { %v2057_v52 = vpack.c.bf16 %v1687_v29, %v1686_v62  ;;  %v1631_v53 = vmax.f32 %v1579_v63, %v1605_v33  ;;  %v1580_v8 = vmax.f32 %v2846_v39, %v1337_v35  ;;  %v1606_v24 = vmax.f32 %v2847_v9, %v1545_v37 }
 0x191   : > { %2083 = vst [vmem:[%s2745_s28 + $0x50] sm:$0xff] %v2062_v18   ;;  %v1666_v25 = vadd.f32 %v2732_v38, %v1633_v54  ;;  %v1634_v40 = vmax.f32 %v1582_v19, %v1608_v36 }
 0x192   : > { %2082 = vst [vmem:[%s2745_s28 + $0x48] sm:$0xff] %v2057_v52   ;;  %v1664_v41 = vadd.f32 %v2732_v38, %v1631_v53  ;;  %v1632_v44 = vmax.f32 %v1580_v8, %v1606_v24 }
 0x193   : > { %v1667_v45 = vadd.f32 %v2732_v38, %v1634_v40  ;;  %v1692_v23 = vmax.f32 %v1666_v25, 0.0 }
 0x194   : > { %v1665_v22 = vadd.f32 %v2732_v38, %v1632_v44  ;;  %v1690_v43 = vmax.f32 %v1664_v41, 0.0 }
 0x195   : > { %v1693_v42 = vmax.f32 %v1667_v45, 0.0 }
 0x196   : > { %v1691_v58 = vmax.f32 %v1665_v22, 0.0 }
 0x197   : > { %v2072_v59 = vpack.c.bf16 %v1693_v42, %v1692_v23 }
 0x198   : > { %v2067_v12 = vpack.c.bf16 %v1691_v58, %v1690_v43 }
 0x199   : > { %2085 = vst [vmem:[%s2745_s28 + $0x60] sm:$0xff] %v2072_v59  }
 0x19a   : > { %2084 = vst [vmem:[%s2745_s28 + $0x58] sm:$0xff] %v2067_v12  }
 0x19b PF: > { %p10_p9 = scmp.ge.s32.totalorder %s2429_s16, 4   ;;  %s2848_s12 = smov %s2386_s13 }
 0x19c   : > { %s2849_s13 = smov %s2438_s19  ;;  %s2850_s14 = smov %s2429_s16 }
 0x19d   :  { %12 = sbr.rel (!%p10_p9) target bundleno = 2 (0x2), region = 108 }

// kernel: lenet_forward.4
= control target key start
LH: loop header
LB: loop body
LE: loop exit
PB: predicated region body
PF: predicated region fallthrough
CT: control target
= control target key end

     0   :  { %s956_s12 = smov 0   ;;  %s958_s13 = smov 0   ;;  %s1095_s0 = inlined_call_operand.vmem [shape: bf16[4,64,256], index: 0, kind: input, shape index: {}]   ;;  %s1096_s1 = inlined_call_operand.vmem [shape: bf16[256,128], index: 1, kind: input, shape index: {}]   ;;  %s1097_s2 = inlined_call_operand.vmem [shape: f32[1,128], index: 2, kind: input, shape index: {}]   ;;  %s1098_s3 = inlined_call_operand.vmem [shape: bf16[64,128], index: 3, kind: output, shape index: {}]  }
   0x1   :  { %s960_s14 = smov 0  }
   0x2 LB: > { %s700_s15 = sadd.s32 4294967295, %s934_s14   ;;  %s973_s16 = sadd.s32 1, %s934_s14   ;;  %s934_s14 = sphi %s960_s14, %s1101_s14   ;;  %s930_s13 = sphi %s958_s13, %s1100_s13   ;;  %s926_s12 = sphi %s956_s12, %s1099_s12  }
   0x3   : > { %s17_s17 = ssub.s32 %s934_s14, %s973_s16  ;;  %s20_s18 = sadd.s32 1, %s930_s13 }
   0x4   : > { %p18_p0 = scmp.eq.s32.totalorder %s17_s17, 0  ;;  %p27_p1 = scmp.ne.s32.totalorder %s930_s13, %s926_s12 }
   0x5   : > { %p28_p2 = scmp.eq.s32.totalorder %s934_s14, 0  ;;  %p703_p4 = scmp.ge.s32.totalorder %s934_s14, 2 }
   0x6   : > { %s982_s19 = scalar_select %p18_p0, %s930_s13, %s20_s18  }
   0x7   : > { %p29_p3 = por %p28_p2, %p27_p1  ;;  %127 = sbr.rel (%p703_p4) target bundleno = 26 (0x1a), region = 24 }
   0xe   : > { %130 = sbr.rel (!%p29_p3) target bundleno = 26 (0x1a), region = 28  ;;  %s132_s20 = sand.u32 (%p29_p3), 1, %s930_s13  }
   0xf   : > { %s752_s21 = sshll.u32 (%p29_p3), %s934_s14, 5  ;;  %s704_s22 = sshll.u32 (%p29_p3), %s132_s20, 7 }
  0x10   : > { %s990_s25 = scalar_lea.vmem (%p29_p3), %s1095_s0, %s752_s21  ;;  %s134_s26 = scalar_lea.vmem (%p29_p3), [#allocation2], %s704_s22 }
  0x11   : > { %v196_v0 = vld [vmem:[%s990_s25] sm:$0xff] (%p29_p3)  ;;  %v198_v1 = vld [vmem:[%s990_s25 + $0x8] sm:$0xff] (%p29_p3)  ;;  %v200_v2 = vld [vmem:[%s990_s25 + $0x10] sm:$0xff] (%p29_p3) }
  0x12   : > { %197 = vst [vmem:[%s134_s26] sm:$0xff] (%p29_p3), %v196_v0  ;;  %199 = vst [vmem:[%s134_s26 + $0x8] sm:$0xff] (%p29_p3), %v198_v1  ;;  %v202_v3 = vld [vmem:[%s990_s25 + $0x18] sm:$0xff] (%p29_p3)  ;;  %v204_v4 = vld [vmem:[%s990_s25 + $0x40] sm:$0xff] (%p29_p3) }
  0x13   : > { %201 = vst [vmem:[%s134_s26 + $0x10] sm:$0xff] (%p29_p3), %v200_v2  ;;  %v206_v5 = vld [vmem:[%s990_s25 + $0x48] sm:$0xff] (%p29_p3)  ;;  %203 = vst [vmem:[%s134_s26 + $0x18] sm:$0xff] (%p29_p3), %v202_v3  ;;  %v208_v6 = vld [vmem:[%s990_s25 + $0x50] sm:$0xff] (%p29_p3) }
  0x14   : > { %205 = vst [vmem:[%s134_s26 + $0x20] sm:$0xff] (%p29_p3), %v204_v4  ;;  %207 = vst [vmem:[%s134_s26 + $0x28] sm:$0xff] (%p29_p3), %v206_v5  ;;  %v210_v7 = vld [vmem:[%s990_s25 + $0x58] sm:$0xff] (%p29_p3)  ;;  %v212_v8 = vld [vmem:[%s990_s25 + $0x80] sm:$0xff] (%p29_p3) }
  0x15   : > { %209 = vst [vmem:[%s134_s26 + $0x30] sm:$0xff] %v208_v6  ;;  %211 = vst [vmem:[%s134_s26 + $0x38] sm:$0xff] %v210_v7  ;;  %v214_v9 = vld [vmem:[%s990_s25 + $0x88] sm:$0xff]  ;;  %v216_v10 = vld [vmem:[%s990_s25 + $0x90] sm:$0xff] }
  0x16   : > { %213 = vst [vmem:[%s134_s26 + $0x40] sm:$0xff] %v212_v8  ;;  %v218_v11 = vld [vmem:[%s990_s25 + $0x98] sm:$0xff]  ;;  %215 = vst [vmem:[%s134_s26 + $0x48] sm:$0xff] %v214_v9  ;;  %v220_v12 = vld [vmem:[%s990_s25 + $0xc0] sm:$0xff] }
  0x17   : > { %217 = vst [vmem:[%s134_s26 + $0x50] sm:$0xff] %v216_v10  ;;  %219 = vst [vmem:[%s134_s26 + $0x58] sm:$0xff] %v218_v11  ;;  %v222_v13 = vld [vmem:[%s990_s25 + $0xc8] sm:$0xff]  ;;  %v224_v14 = vld [vmem:[%s990_s25 + $0xd0] sm:$0xff] }
  0x18   : > { %221 = vst [vmem:[%s134_s26 + $0x60] sm:$0xff] %v220_v12  ;;  %223 = vst [vmem:[%s134_s26 + $0x68] sm:$0xff] %v222_v13  ;;  %v226_v15 = vld [vmem:[%s990_s25 + $0xd8] sm:$0xff] }
  0x19   : > { %225 = vst [vmem:[%s134_s26 + $0x70] sm:$0xff] %v224_v14  ;;  %227 = vst [vmem:[%s134_s26 + $0x78] sm:$0xff] %v226_v15 }
  0x1a PF: > { %p708_p5 = scmp.ge.s32.totalorder %s934_s14, 1  ;;  %p232_p6 = scmp.lt.s32.totalorder %s934_s14, 3 }
  0x1c   : > { %p233_p7 = pnand %p708_p5, %p232_p6 }
  0x1d   : > { %v872_v16 = vld [vmem:[%s1096_s1 + $0x40] sm:$0xff] (!%p233_p7)   ;;  %v874_v18 = vld [vmem:[%s1096_s1 + $0x48] sm:$0xff] (!%p233_p7)   ;;  %v876_v20 = vld [vmem:[%s1096_s1 + $0x50] sm:$0xff] (!%p233_p7)   ;;  %s239_s20 = sand.u32 (!%p233_p7), 1, %s926_s12   ;;  %s710_s18 = sshll.u32 (!%p233_p7), %s700_s15, 2 }
  0x1e   : > { %236 = sbr.rel (%p233_p7) target bundleno = 315 (0x13b), region = 66  ;;  %v873_v17 = vld [vmem:[%s1096_s1] sm:$0xff] (!%p233_p7)   ;;  %768 = vmatprep.subr.bf16.mxu0 (!%p233_p7), %v872_v16  ;;  %832 = vmatprep.subr.bf16.mxu1 (!%p233_p7), %v872_v16  ;;  %v875_v19 = vld [vmem:[%s1096_s1 + $0x8] sm:$0xff] (!%p233_p7)   ;;  %v877_v21 = vld [vmem:[%s1096_s1 + $0x10] sm:$0xff] (!%p233_p7)   ;;  %s709_s23 = sshll.u32 (!%p233_p7), %s239_s20, 7 }
  0x1f   : > { %769 = vmatpush3.bf16.msra.mxu0 (!%p233_p7), %v873_v17  ;;  %840 = vmatpush3.bf16.msra.mxu1 (!%p233_p7), %v873_v17  ;;  %v878_v22 = vld [vmem:[%s1096_s1 + $0x58] sm:$0xff] (!%p233_p7)   ;;  %v880_v24 = vld [vmem:[%s1096_s1 + $0x60] sm:$0xff] (!%p233_p7)   ;;  %v882_v26 = vld [vmem:[%s1096_s1 + $0x68] sm:$0xff] (!%p233_p7)   ;;  %s1044_s29 = scalar_lea.vmem (!%p233_p7), [#allocation2], %s709_s23  ;;  %p264_p8 = scmp.lt.s32.totalorder (!%p233_p7), %s710_s18, 7 }
  0x20   : > { %770 = vmatprep.subr.bf16.mxu0 (!%p233_p7), %v874_v18  ;;  %833 = vmatprep.subr.bf16.mxu1 (!%p233_p7), %v874_v18  ;;  %v879_v23 = vld [vmem:[%s1096_s1 + $0x18] sm:$0xff] (!%p233_p7)   ;;  %v881_v25 = vld [vmem:[%s1096_s1 + $0x20] sm:$0xff] (!%p233_p7)   ;;  %v883_v29 = vld [vmem:[%s1096_s1 + $0x28] sm:$0xff] (!%p233_p7)  }
  0x21   : > { %v890_v27 = vld [vmem:[%s1044_s29 + $0x4] ss:$8 sps:$4 sm:$0xff] (!%p233_p7)   ;;  %v884_v30 = vld [vmem:[%s1096_s1 + $0x70] sm:$0xff] (!%p233_p7)   ;;  %v886_v32 = vld [vmem:[%s1096_s1 + $0x78] sm:$0xff] (!%p233_p7)  }
  0x22   : > { %v893_v28 = vld [vmem:[%s1044_s29 + $0x44] ss:$8 sps:$4 sm:$0xff] (!%p233_p7)   ;;  %526 = vmatprep.mubr.bf16.mxu0 (!%p233_p7), %v890_v27  ;;  %v885_v31 = vld [vmem:[%s1096_s1 + $0x30] sm:$0xff] (!%p233_p7)   ;;  %v887_v33 = vld [vmem:[%s1096_s1 + $0x38] sm:$0xff] (!%p233_p7)  }
  0x23   : > { %771 = vmatpush3.bf16.msra.mxu0 (!%p233_p7), %v875_v19  ;;  %841 = vmatpush3.bf16.msra.mxu1 (!%p233_p7), %v875_v19  ;;  %v888_v34 = vld [vmem:[%s1044_s29] ss:$8 sps:$4 sm:$0xff] (!%p233_p7)   ;;  %v894_v36 = vld [vmem:[%s1044_s29 + $0x14] ss:$8 sps:$4 sm:$0xff] (!%p233_p7)   ;;  %v898_v38 = vld [vmem:[%s1044_s29 + $0x10] ss:$8 sps:$4 sm:$0xff] (!%p233_p7)  }
  0x24   : > { %772 = vmatprep.subr.bf16.mxu0 (!%p233_p7), %v876_v20  ;;  %834 = vmatprep.subr.bf16.mxu1 (!%p233_p7), %v876_v20  ;;  %v891_v35 = vld [vmem:[%s1044_s29 + $0x40] ss:$8 sps:$4 sm:$0xff] (!%p233_p7)   ;;  %v896_v37 = vld [vmem:[%s1044_s29 + $0x54] ss:$8 sps:$4 sm:$0xff] (!%p233_p7)   ;;  %v899_v39 = vld [vmem:[%s1044_s29 + $0x50] ss:$8 sps:$4 sm:$0xff] (!%p233_p7)  }
  0x25   : > { %558 = vmatprep.mubr.bf16.mxu1 %v893_v28  ;;  %v900_v40 = vld [vmem:[%s1044_s29 + $0x24] ss:$8 sps:$4 sm:$0xff]   ;;  %v904_v42 = vld [vmem:[%s1044_s29 + $0x20] ss:$8 sps:$4 sm:$0xff]   ;;  %v906_v44 = vld [vmem:[%s1044_s29 + $0x34] ss:$8 sps:$4 sm:$0xff]  }
  0x26   : > { %v902_v41 = vld [vmem:[%s1044_s29 + $0x64] ss:$8 sps:$4 sm:$0xff]   ;;  %v905_v43 = vld [vmem:[%s1044_s29 + $0x60] ss:$8 sps:$4 sm:$0xff]   ;;  %v908_v45 = vld [vmem:[%s1044_s29 + $0x74] ss:$8 sps:$4 sm:$0xff]  }
  0x27   : > { %773 = vmatpush3.bf16.msra.mxu0 %v877_v21  ;;  %842 = vmatpush3.bf16.msra.mxu1 %v877_v21  ;;  %v910_v46 = vld [vmem:[%s1044_s29 + $0x30] ss:$8 sps:$4 sm:$0xff]   ;;  %s1103_s18 = smov (!%p264_p8, %s710_s18), 7 }
  0x28   : > { %774 = vmatprep.subr.bf16.mxu0 %v878_v22  ;;  %835 = vmatprep.subr.bf16.mxu1 %v878_v22  ;;  %v911_v47 = vld [vmem:[%s1044_s29 + $0x70] ss:$8 sps:$4 sm:$0xff]   ;;  %v744_v22 = vld [vmem:[%s1097_s2] ss:$0 sm:$0xff]  ;;  %s711_s14 = sshll.u32 %s1103_s18, 2 }
  0x29   : > { %s267_s23 = scalar_lea.vmem %s1098_s3, %s711_s14 }
  0x2b   : > { %775 = vmatpush3.bf16.msra.mxu0 %v879_v23  ;;  %843 = vmatpush3.bf16.msra.mxu1 %v879_v23 }
  0x2c   : > { %776 = vmatprep.subr.bf16.mxu0 %v880_v24  ;;  %836 = vmatprep.subr.bf16.mxu1 %v880_v24 }
  0x2f   : > { %777 = vmatpush3.bf16.msra.mxu0 %v881_v25  ;;  %844 = vmatpush3.bf16.msra.mxu1 %v881_v25 }
  0x30   : > { %778 = vmatprep.subr.bf16.mxu0 %v882_v26  ;;  %837 = vmatprep.subr.bf16.mxu1 %v882_v26 }
  0x33   : > { %779 = vmatpush3.bf16.msra.mxu0 %v883_v29  ;;  %845 = vmatpush3.bf16.msra.mxu1 %v883_v29 }
  0x34   : > { %780 = vmatprep.subr.bf16.mxu0 %v884_v30  ;;  %838 = vmatprep.subr.bf16.mxu1 %v884_v30 }
  0x37   : > { %781 = vmatpush3.bf16.msra.mxu0 %v885_v31  ;;  %846 = vmatpush3.bf16.msra.mxu1 %v885_v31 }
  0x38   : > { %782 = vmatprep.subr.bf16.mxu0 %v886_v32  ;;  %839 = vmatprep.subr.bf16.mxu1 %v886_v32 }
  0x3b   : > { %783 = vmatpush3.bf16.msra.mxu0 %v887_v33  ;;  %847 = vmatpush3.bf16.msra.mxu1 %v887_v33 }
  0x3e   : > { %527 = vmatmul.mubr.bf16.vlgmr.msra.gmra.mrb[0].mxu0 %v888_v34  ;;  %559 = vmatmul.mubr.bf16.vlgmr.msra.gmra.mrb[0].mxu1 %v891_v35 }
  0x3f   : > { %534 = vmatprep.mubr.bf16.mxu0 %v894_v36  ;;  %566 = vmatprep.mubr.bf16.mxu1 %v896_v37 }
  0x46   : > { %535 = vmatmul.mubr.bf16.gmra.mrb[4].mxu0 %v898_v38  ;;  %567 = vmatmul.mubr.bf16.gmra.mrb[4].mxu1 %v899_v39 }
  0x47   : > { %542 = vmatprep.mubr.bf16.mxu0 %v900_v40  ;;  %574 = vmatprep.mubr.bf16.mxu1 %v902_v41 }
  0x4e   : > { %543 = vmatmul.mubr.bf16.gmra.mrb[8].mxu0 %v904_v42  ;;  %575 = vmatmul.mubr.bf16.gmra.mrb[8].mxu1 %v905_v43 }
  0x4f   : > { %550 = vmatprep.mubr.bf16.mxu0 %v906_v44  ;;  %582 = vmatprep.mubr.bf16.mxu1 %v908_v45 }
  0x56   : > { %551 = vmatmul.mubr.bf16.gmra.mrb[12].mxu0 %v910_v46  ;;  %583 = vmatmul.mubr.bf16.gmra.mrb[12].mxu1 %v911_v47 }
 0x111   : > { %v784_v48 = vpop.f32.mrb[0].mxu0  ;;  %v808_v49 = vpop.f32.mrb[0].mxu1 }
 0x112   : > { %v785_v50 = vpop.f32.mrb[1].mxu0  ;;  %v809_v51 = vpop.f32.mrb[1].mxu1 }
 0x113   : > { %v786_v52 = vadd.f32 %v785_v50, %v784_v48  ;;  %v810_v53 = vadd.f32 %v809_v51, %v808_v49  ;;  %v787_v54 = vpop.f32.mrb[2].mxu0  ;;  %v811_v55 = vpop.f32.mrb[2].mxu1 }
 0x114   : > { %v788_v56 = vpop.f32.mrb[3].mxu0  ;;  %v812_v57 = vpop.f32.mrb[3].mxu1 }
 0x115   : > { %v789_v58 = vadd.f32 %v788_v56, %v787_v54  ;;  %v813_v59 = vadd.f32 %v812_v57, %v811_v55 }
 0x119   : > { %v790_v60 = vpop.f32.mrb[4].mxu0  ;;  %v814_v61 = vpop.f32.mrb[4].mxu1 }
 0x11a   : > { %v791_v62 = vpop.f32.mrb[5].mxu0  ;;  %v815_v63 = vpop.f32.mrb[5].mxu1 }
 0x11b   : > { %v792_v0 = vadd.f32 %v791_v62, %v790_v60  ;;  %v816_v1 = vadd.f32 %v815_v63, %v814_v61  ;;  %v793_v2 = vpop.f32.mrb[6].mxu0  ;;  %v817_v3 = vpop.f32.mrb[6].mxu1 }
 0x11c   : > { %v794_v4 = vpop.f32.mrb[7].mxu0  ;;  %v818_v5 = vpop.f32.mrb[7].mxu1 }
 0x11d   : > { %v795_v6 = vadd.f32 %v794_v4, %v793_v2  ;;  %v819_v7 = vadd.f32 %v818_v5, %v817_v3 }
 0x121   : > { %v796_v8 = vpop.f32.mrb[8].mxu0  ;;  %v820_v9 = vpop.f32.mrb[8].mxu1 }
 0x122   : > { %v797_v10 = vpop.f32.mrb[9].mxu0  ;;  %v821_v11 = vpop.f32.mrb[9].mxu1 }
 0x123   : > { %v798_v12 = vadd.f32 %v797_v10, %v796_v8  ;;  %v822_v13 = vadd.f32 %v821_v11, %v820_v9  ;;  %v799_v14 = vpop.f32.mrb[10].mxu0  ;;  %v823_v15 = vpop.f32.mrb[10].mxu1 }
 0x124   : > { %v800_v16 = vpop.f32.mrb[11].mxu0  ;;  %v824_v17 = vpop.f32.mrb[11].mxu1 }
 0x125   : > { %v591_v18 = vmax.f32 %v786_v52, %v798_v12  ;;  %v595_v19 = vmax.f32 %v810_v53, %v822_v13  ;;  %v801_v20 = vadd.f32 %v800_v16, %v799_v14  ;;  %v825_v21 = vadd.f32 %v824_v17, %v823_v15 }
 0x127   : > { %v599_v23 = vmax.f32 %v591_v18, %v595_v19  ;;  %v592_v24 = vmax.f32 %v789_v58, %v801_v20  ;;  %v596_v25 = vmax.f32 %v813_v59, %v825_v21 }
 0x129   : > { %v610_v26 = vadd.f32 %v744_v22, %v599_v23  ;;  %v600_v27 = vmax.f32 %v592_v24, %v596_v25  ;;  %v802_v28 = vpop.f32.mrb[12].mxu0  ;;  %v826_v29 = vpop.f32.mrb[12].mxu1 }
 0x12a   : > { %v803_v30 = vpop.f32.mrb[13].mxu0  ;;  %v827_v31 = vpop.f32.mrb[13].mxu1 }
 0x12b   : > { %v611_v32 = vadd.f32 %v744_v22, %v600_v27  ;;  %v804_v33 = vadd.f32 %v803_v30, %v802_v28  ;;  %v828_v34 = vadd.f32 %v827_v31, %v826_v29  ;;  %v805_v35 = vpop.f32.mrb[14].mxu0  ;;  %v829_v36 = vpop.f32.mrb[14].mxu1  ;;  %v614_v37 = vmax.f32 %v610_v26, 0.0 }
 0x12c   : > { %v806_v38 = vpop.f32.mrb[15].mxu0  ;;  %v830_v39 = vpop.f32.mrb[15].mxu1 }
 0x12d   : > { %v615_v40 = vmax.f32 %v611_v32, 0.0  ;;  %v593_v41 = vmax.f32 %v792_v0, %v804_v33  ;;  %v597_v42 = vmax.f32 %v816_v1, %v828_v34  ;;  %v807_v43 = vadd.f32 %v806_v38, %v805_v35 }
 0x12e   : > { %v831_v44 = vadd.f32 %v830_v39, %v829_v36 }
 0x12f   : > { %v760_v45 = vpack.c.bf16 %v615_v40, %v614_v37  ;;  %v601_v46 = vmax.f32 %v593_v41, %v597_v42  ;;  %v594_v47 = vmax.f32 %v795_v6, %v807_v43 }
 0x130   : > { %v598_v48 = vmax.f32 %v819_v7, %v831_v44 }
 0x131   : > { %761 = vst [vmem:[%s267_s23] sm:$0xff] %v760_v45   ;;  %v612_v49 = vadd.f32 %v744_v22, %v601_v46 }
 0x132   : > { %v602_v50 = vmax.f32 %v594_v47, %v598_v48 }
 0x133   : > { %v616_v52 = vmax.f32 %v612_v49, 0.0 }
 0x134   : > { %v613_v51 = vadd.f32 %v744_v22, %v602_v50 }
 0x136   : > { %v617_v53 = vmax.f32 %v613_v51, 0.0 }
 0x138   : > { %v765_v54 = vpack.c.bf16 %v617_v53, %v616_v52 }
 0x13a   : > { %767 = vst [vmem:[%s267_s23 + $0x8] sm:$0xff] %v765_v54  }
 0x13b PF: > { %p10_p9 = scmp.ge.s32.totalorder %s973_s16, 4   ;;  %s1099_s12 = smov %s930_s13 }
 0x13c   : > { %s1100_s13 = smov %s982_s19  ;;  %s1101_s14 = smov %s973_s16 }
 0x13d   :  { %12 = sbr.rel (!%p10_p9) target bundleno = 2 (0x2), region = 105 }

// kernel: lenet_forward.5
= control target key start
LH: loop header
LB: loop body
LE: loop exit
PB: predicated region body
PF: predicated region fallthrough
CT: control target
= control target key end

     0   :  { %s1227_s24 = smov 0   ;;  %s1421_s0 = inlined_call_operand.vmem [shape: bf16[32,512], index: 0, kind: input, shape index: {}]   ;;  %s1422_s1 = inlined_call_operand.vmem [shape: bf16[512,128], index: 1, kind: input, shape index: {}]   ;;  %s1423_s2 = inlined_call_operand.vmem [shape: f32[1,128], index: 2, kind: input, shape index: {}]   ;;  %s1424_s3 = inlined_call_operand.vmem [shape: bf16[128,128], index: 3, kind: input, shape index: {}]   ;;  %s1425_s4 = inlined_call_operand.vmem [shape: f32[1,128], index: 4, kind: input, shape index: {}]   ;;  %s1426_s5 = inlined_call_operand.vmem [shape: bf16[128,128], index: 5, kind: input, shape index: {}]   ;;  %s1427_s6 = inlined_call_operand.vmem [shape: f32[1,128], index: 6, kind: input, shape index: {}]   ;;  %s1428_s7 = inlined_call_operand.vmem [shape: f32[32,128], index: 7, kind: output, shape index: {}]  }
   0x1 LB: > { %s943_s25 = sadd.s32 4294967295, %s1183_s24   ;;  %p947_p0 = scmp.ge.s32.totalorder %s1183_s24, 1  ;;  %s1183_s24 = sphi %s1227_s24, %s17_s24  }
   0x2   : > { %p239_p1 = scmp.lt.s32.totalorder %s1183_s24, 3 }
   0x4   : > { %p240_p2 = pnand %p947_p0, %p239_p1 }
   0x5   : > { %v1123_v0 = vld [vmem:[%s1422_s1 + $0x40] sm:$0xff] (!%p240_p2)   ;;  %v1127_v4 = vld [vmem:[%s1422_s1 + $0x48] sm:$0xff] (!%p240_p2)   ;;  %v1131_v8 = vld [vmem:[%s1422_s1 + $0x50] sm:$0xff] (!%p240_p2)   ;;  %s948_s14 = sshll.u32 (!%p240_p2), %s943_s25, 1  ;;  %v1185_v34 = vmov (!%p240_p2), 0.0   ;;  %vm1186_vm0 = vmmov (!%p240_p2), 0  }
   0x6   : > { %243 = sbr.rel (%p240_p2) target bundleno = 701 (0x2bd), region = 48  ;;  %v1124_v1 = vld [vmem:[%s1422_s1 + $0xc0] sm:$0xff] (!%p240_p2)   ;;  %1011 = vmatprep.subr.bf16.mxu0 (!%p240_p2), %v1123_v0  ;;  %v1128_v5 = vld [vmem:[%s1422_s1 + $0xc8] sm:$0xff] (!%p240_p2)   ;;  %v1132_v9 = vld [vmem:[%s1422_s1 + $0xd0] sm:$0xff] (!%p240_p2)   ;;  %p273_p3 = scmp.lt.s32.totalorder (!%p240_p2), %s948_s14, 3 }
   0x7   : > { %v1125_v2 = vld [vmem:[%s1422_s1] sm:$0xff] (!%p240_p2)   ;;  %1033 = vmatprep.subr.bf16.mxu1 (!%p240_p2), %v1124_v1  ;;  %v1129_v6 = vld [vmem:[%s1422_s1 + $0x8] sm:$0xff] (!%p240_p2)   ;;  %v1133_v10 = vld [vmem:[%s1422_s1 + $0x10] sm:$0xff] (!%p240_p2)  }
   0x8   : > { %v1126_v3 = vld [vmem:[%s1422_s1 + $0x80] sm:$0xff] (!%p240_p2)   ;;  %1012 = vmatpush3.bf16.msra.mxu0 (!%p240_p2), %v1125_v2  ;;  %v1130_v7 = vld [vmem:[%s1422_s1 + $0x88] sm:$0xff] (!%p240_p2)   ;;  %v1134_v11 = vld [vmem:[%s1422_s1 + $0x90] sm:$0xff] (!%p240_p2)  }
   0x9   : > { %1034 = vmatpush3.bf16.msra.mxu1 (!%p240_p2), %v1126_v3  ;;  %1013 = vmatprep.subr.bf16.mxu0 (!%p240_p2), %v1127_v4  ;;  %v1135_v12 = vld [vmem:[%s1422_s1 + $0x58] sm:$0xff] (!%p240_p2)   ;;  %v1139_v16 = vld [vmem:[%s1422_s1 + $0x60] sm:$0xff] (!%p240_p2)   ;;  %v1143_v20 = vld [vmem:[%s1422_s1 + $0x68] sm:$0xff] (!%p240_p2)  }
   0xa   : > { %1035 = vmatprep.subr.bf16.mxu1 (!%p240_p2), %v1128_v5  ;;  %v1136_v13 = vld [vmem:[%s1422_s1 + $0xd8] sm:$0xff] (!%p240_p2)   ;;  %v1140_v17 = vld [vmem:[%s1422_s1 + $0xe0] sm:$0xff] (!%p240_p2)   ;;  %v1144_v21 = vld [vmem:[%s1422_s1 + $0xe8] sm:$0xff] (!%p240_p2)  }
   0xb   : > { %v1137_v14 = vld [vmem:[%s1422_s1 + $0x18] sm:$0xff] (!%p240_p2)   ;;  %v1141_v18 = vld [vmem:[%s1422_s1 + $0x20] sm:$0xff] (!%p240_p2)   ;;  %v1145_v22 = vld [vmem:[%s1422_s1 + $0x28] sm:$0xff] (!%p240_p2)  }
   0xc   : > { %1014 = vmatpush3.bf16.msra.mxu0 (!%p240_p2), %v1129_v6  ;;  %v1138_v15 = vld [vmem:[%s1422_s1 + $0x98] sm:$0xff] (!%p240_p2)   ;;  %v1142_v19 = vld [vmem:[%s1422_s1 + $0xa0] sm:$0xff] (!%p240_p2)   ;;  %v1146_v23 = vld [vmem:[%s1422_s1 + $0xa8] sm:$0xff] (!%p240_p2)  }
   0xd   : > { %1036 = vmatpush3.bf16.msra.mxu1 %v1130_v7  ;;  %1015 = vmatprep.subr.bf16.mxu0 %v1131_v8  ;;  %s1430_s14 = smov (!%p273_p3, %s948_s14), 3  ;;  %v1147_v24 = vld [vmem:[%s1422_s1 + $0x70] sm:$0xff]   ;;  %v1151_v28 = vld [vmem:[%s1422_s1 + $0x78] sm:$0xff]   ;;  %v1161_v37 = vld [vmem:[%s1424_s3] sm:$0xff]  }
   0xe   : > { %1037 = vmatprep.subr.bf16.mxu1 %v1132_v9  ;;  %v1148_v25 = vld [vmem:[%s1422_s1 + $0xf0] sm:$0xff]   ;;  %s1010_s16 = sshll.u32 %s1430_s14, 4  ;;  %v1152_v29 = vld [vmem:[%s1422_s1 + $0xf8] sm:$0xff]   ;;  %v1162_v38 = vld [vmem:[%s1424_s3 + $0x8] sm:$0xff]   ;;  %s952_s23 = sshll.u32 %s1430_s14, 3 }
   0xf   : > { %v1149_v26 = vld [vmem:[%s1422_s1 + $0x30] sm:$0xff]   ;;  %s277_s26 = scalar_lea.vmem %s1421_s0, %s1010_s16  ;;  %v1153_v30 = vld [vmem:[%s1422_s1 + $0x38] sm:$0xff]   ;;  %v1165_v41 = vld [vmem:[%s1424_s3 + $0x20] sm:$0xff]   ;;  %s283_s30 = scalar_lea.vmem %s1428_s7, %s952_s23 }
  0x10   : > { %1016 = vmatpush3.bf16.msra.mxu0 %v1133_v10  ;;  %v1150_v27 = vld [vmem:[%s1422_s1 + $0xb0] sm:$0xff]   ;;  %v1154_v31 = vld [vmem:[%s1422_s1 + $0xb8] sm:$0xff]   ;;  %v1166_v42 = vld [vmem:[%s1424_s3 + $0x28] sm:$0xff]  }
  0x11   : > { %1038 = vmatpush3.bf16.msra.mxu1 %v1134_v11  ;;  %1017 = vmatprep.subr.bf16.mxu0 %v1135_v12  ;;  %v1155_v32 = vld [vmem:[%s277_s26] ss:$16 sps:$4 sm:$0xff]   ;;  %v1157_v33 = vld [vmem:[%s277_s26 + $0x4] ss:$16 sps:$4 sm:$0xff]   ;;  %v1158_v35 = vld [vmem:[%s277_s26 + $0x8] ss:$16 sps:$4 sm:$0xff]  }
  0x12   : > { %1039 = vmatprep.subr.bf16.mxu1 %v1136_v13  ;;  %v1160_v36 = vld [vmem:[%s277_s26 + $0xc] ss:$16 sps:$4 sm:$0xff]   ;;  %605 = vmatprep.mubr.bf16.mxu0 %v1157_v33  ;;  %v1163_v39 = vld [vmem:[%s1424_s3 + $0x10] sm:$0xff]   ;;  %v1169_v45 = vld [vmem:[%s1426_s5] sm:$0xff]  }
  0x13   : > { %646 = vmatprep.mubr.bf16.mxu1 %v1160_v36  ;;  %v1164_v40 = vld [vmem:[%s1424_s3 + $0x18] sm:$0xff]   ;;  %v1167_v43 = vld [vmem:[%s1424_s3 + $0x30] sm:$0xff]   ;;  %v1170_v46 = vld [vmem:[%s1426_s5 + $0x8] sm:$0xff]  }
  0x14   : > { %1018 = vmatpush3.bf16.msra.mxu0 %v1137_v14  ;;  %v1168_v44 = vld [vmem:[%s1424_s3 + $0x38] sm:$0xff]   ;;  %v1171_v47 = vld [vmem:[%s1426_s5 + $0x10] sm:$0xff]   ;;  %v1173_v49 = vld [vmem:[%s1426_s5 + $0x20] sm:$0xff]  }
  0x15   : > { %1040 = vmatpush3.bf16.msra.mxu1 %v1138_v15  ;;  %1019 = vmatprep.subr.bf16.mxu0 %v1139_v16  ;;  %v1172_v48 = vld [vmem:[%s1426_s5 + $0x18] sm:$0xff]   ;;  %v1174_v50 = vld [vmem:[%s1426_s5 + $0x28] sm:$0xff]   ;;  %v953_v53 = vld [vmem:[%s1423_s2] ss:$0 sm:$0xff] }
  0x16   : > { %1041 = vmatprep.subr.bf16.mxu1 %v1140_v17  ;;  %v1175_v7 = vld [vmem:[%s1426_s5 + $0x30] sm:$0xff]   ;;  %v1176_v8 = vld [vmem:[%s1426_s5 + $0x38] sm:$0xff]   ;;  %v990_v9 = vld [vmem:[%s1425_s4] ss:$0 sm:$0xff] }
  0x18   : > { %1020 = vmatpush3.bf16.msra.mxu0 %v1141_v18 }
  0x19   : > { %1042 = vmatpush3.bf16.msra.mxu1 %v1142_v19  ;;  %1021 = vmatprep.subr.bf16.mxu0 %v1143_v20  ;;  %v999_v19 = vld [vmem:[%s1427_s6] ss:$0 sm:$0xff] }
  0x1a   : > { %1043 = vmatprep.subr.bf16.mxu1 %v1144_v21 }
  0x1c   : > { %1022 = vmatpush3.bf16.msra.mxu0 %v1145_v22 }
  0x1d   : > { %1044 = vmatpush3.bf16.msra.mxu1 %v1146_v23  ;;  %1023 = vmatprep.subr.bf16.mxu0 %v1147_v24 }
  0x1e   : > { %1045 = vmatprep.subr.bf16.mxu1 %v1148_v25 }
  0x20   : > { %1024 = vmatpush3.bf16.msra.mxu0 %v1149_v26 }
  0x21   : > { %1046 = vmatpush3.bf16.msra.mxu1 %v1150_v27  ;;  %1025 = vmatprep.subr.bf16.mxu0 %v1151_v28 }
  0x22   : > { %1047 = vmatprep.subr.bf16.mxu1 %v1152_v29 }
  0x24   : > { %1026 = vmatpush3.bf16.msra.mxu0 %v1153_v30 }
  0x25   : > { %1048 = vmatpush3.bf16.msra.mxu1 %v1154_v31  ;;  %1073 = vmatprep.subr.bf16.mxu0 %v1185_v34 }
  0x26   : > { %1093 = vmatprep.subr.bf16.mxu1 %v1185_v34 }
  0x27   : > { %606 = vmatmul.mubr.bf16.vlgmr.msra.gmra.mrb[0].mxu0 %v1155_v32 }
  0x28   : > { %647 = vmatmul.mubr.bf16.vlgmr.msra.gmra.mrb[0].mxu1 %v1158_v35  ;;  %1074 = vmatpush3.bf16.msra.mxu0 %v1161_v37 }
  0x29   : > { %1075 = vmatprep.subr.bf16.mxu0 %v1185_v34  ;;  %1089 = vmatprep.mubr.msk.bf16.mxu0 %vm1186_vm0, %v1185_v34 }
  0x2a   : > { %1109 = vmatprep.mubr.msk.bf16.mxu1 %vm1186_vm0, %v1185_v34  ;;  %1094 = vmatpush3.bf16.msra.mxu1 %v1169_v45 }
  0x2b   : > { %1095 = vmatprep.subr.bf16.mxu1 %v1185_v34 }
  0x2c   : > { %1076 = vmatpush3.bf16.msra.mxu0 %v1162_v38 }
  0x2d   : > { %1077 = vmatprep.subr.bf16.mxu0 %v1185_v34 }
  0x2e   : > { %1096 = vmatpush3.bf16.msra.mxu1 %v1170_v46 }
  0x2f   : > { %1097 = vmatprep.subr.bf16.mxu1 %v1185_v34 }
  0x30   : > { %1078 = vmatpush3.bf16.msra.mxu0 %v1163_v39 }
  0x31   : > { %1079 = vmatprep.subr.bf16.mxu0 %v1185_v34 }
  0x32   : > { %1098 = vmatpush3.bf16.msra.mxu1 %v1171_v47 }
  0x33   : > { %1099 = vmatprep.subr.bf16.mxu1 %v1185_v34 }
  0x34   : > { %1080 = vmatpush3.bf16.msra.mxu0 %v1164_v40 }
  0x35   : > { %1081 = vmatprep.subr.bf16.mxu0 %v1185_v34 }
  0x36   : > { %1100 = vmatpush3.bf16.msra.mxu1 %v1172_v48 }
  0x37   : > { %1101 = vmatprep.subr.bf16.mxu1 %v1185_v34 }
  0x38   : > { %1082 = vmatpush3.bf16.msra.mxu0 %v1165_v41 }
  0x39   : > { %1083 = vmatprep.subr.bf16.mxu0 %v1185_v34 }
  0x3a   : > { %1102 = vmatpush3.bf16.msra.mxu1 %v1173_v49 }
  0x3b   : > { %1103 = vmatprep.subr.bf16.mxu1 %v1185_v34 }
  0x3c   : > { %1084 = vmatpush3.bf16.msra.mxu0 %v1166_v42 }
  0x3d   : > { %1085 = vmatprep.subr.bf16.mxu0 %v1185_v34 }
  0x3e   : > { %1104 = vmatpush3.bf16.msra.mxu1 %v1174_v50 }
  0x3f   : > { %1105 = vmatprep.subr.bf16.mxu1 %v1185_v34 }
  0x40   : > { %1086 = vmatpush3.bf16.msra.mxu0 %v1167_v43 }
  0x41   : > { %1087 = vmatprep.subr.bf16.mxu0 %v1185_v34 }
  0x42   : > { %1106 = vmatpush3.bf16.msra.mxu1 %v1175_v7 }
  0x43   : > { %1107 = vmatprep.subr.bf16.mxu1 %v1185_v34 }
  0x44   : > { %1088 = vmatpush3.bf16.msra.mxu0 %v1168_v44 }
  0x46   : > { %1108 = vmatpush3.bf16.msra.mxu1 %v1176_v8 }
  0xfa   : > { %v1027_v51 = vpop.f32.mrb[0].mxu0 }
  0xfb   : > { %v1049_v52 = vpop.f32.mrb[0].mxu1  ;;  %v1028_v54 = vpop.f32.mrb[1].mxu0 }
  0xfc   : > { %v1029_v55 = vadd.f32 %v1028_v54, %v1027_v51  ;;  %v1050_v56 = vpop.f32.mrb[1].mxu1  ;;  %v1030_v57 = vpop.f32.mrb[2].mxu0 }
  0xfd   : > { %v1051_v58 = vadd.f32 %v1050_v56, %v1049_v52  ;;  %v1052_v59 = vpop.f32.mrb[2].mxu1  ;;  %v1031_v60 = vpop.f32.mrb[3].mxu0 }
  0xfe   : > { %v608_v61 = vadd.f32 %v1029_v55, %v953_v53  ;;  %v1032_v62 = vadd.f32 %v1031_v60, %v1030_v57  ;;  %v1053_v63 = vpop.f32.mrb[3].mxu1 }
  0xff   : > { %v1054_v0 = vadd.f32 %v1053_v63, %v1052_v59 }
 0x100   : > { %v649_v1 = vadd.f32 %v1051_v58, %v608_v61  ;;  %v611_v2 = vadd.f32 %v1032_v62, %v953_v53 }
 0x102   : > { %v652_v3 = vadd.f32 %v1054_v0, %v611_v2  ;;  %v655_v4 = vmax.f32 %v649_v1, 0.0 }
 0x104   : > { %v656_v5 = vmax.f32 %v652_v3, 0.0 }
 0x106   : > { %v657_v6 = vpack.c.bf16 %v656_v5, %v655_v4 }
 0x108   : > { %1090 = vmatmul.mubr.bf16.vlgmr.msra.gmra.mrb[4].mxu0 %v657_v6 }
 0x1db   : > { %v763_v10 = vpop.f32.mrb[4].mxu0 }
 0x1dc   : > { %v764_v11 = vadd.f32 %v990_v9, %v763_v10  ;;  %v1091_v12 = vpop.f32.mrb[5].mxu0 }
 0x1dd   : > { %v766_v13 = vpop.f32.mrb[6].mxu0 }
 0x1de   : > { %v767_v14 = vadd.f32 %v990_v9, %v766_v13  ;;  %v1092_v15 = vpop.f32.mrb[7].mxu0  ;;  %v770_v16 = vmax.f32 %v764_v11, 0.0 }
 0x1e0   : > { %v771_v17 = vmax.f32 %v767_v14, 0.0 }
 0x1e2   : > { %v772_v18 = vpack.c.bf16 %v771_v17, %v770_v16 }
 0x1e4   : > { %1110 = vmatmul.mubr.bf16.vlgmr.msra.gmra.mrb[4].mxu1 %v772_v18 }
 0x2b7   : > { %v878_v20 = vpop.f32.mrb[4].mxu1 }
 0x2b8   : > { %v879_v21 = vadd.f32 %v999_v19, %v878_v20  ;;  %v1111_v22 = vpop.f32.mrb[5].mxu1 }
 0x2b9   : > { %v881_v23 = vpop.f32.mrb[6].mxu1 }
 0x2ba   : > { %885 = vst [vmem:[%s283_s30] sm:$0xff] %v879_v21  ;;  %v882_v24 = vadd.f32 %v999_v19, %v881_v23  ;;  %v1112_v25 = vpop.f32.mrb[7].mxu1 }
 0x2bc   : > { %886 = vst [vmem:[%s283_s30 + $0x8] sm:$0xff] %v882_v24 }
 0x2bd PF: > { %s17_s24 = sadd.s32 1, %s1183_s24  }
 0x2be   : > { %p14_p4 = scmp.ge.s32.totalorder %s17_s24, 4  }
 0x2c0   :  { %16 = sbr.rel (!%p14_p4) target bundleno = 1 (0x1), region = 78 }

</bundles_post_ra>
